<compile_context>
chip_gen: v6e
topology: v6e:2x2x1
jax: 0.10.0
libtpu: 0.0.40
codegen_flags: <defaults>
</compile_context>

<pallas_src>
import functools

import jax
import jax.numpy as jnp
import numpy as np
from jax.experimental import pallas as pl
from jax.experimental.pallas import tpu as pltpu


def _round_up(a, b):
    return (a + b - 1) // b * b


def mixconv_kernel(x_ref, xt_ref, xb_ref, *rest, ks, c_split, slope):
    """Fused MixConv2d forward for one (image, row-tile) grid step.

    refs:
      x_ref    : (1, TH, W, C1)   current row tile of x (input dtype)
      xt_ref   : (1, P', W, C1)   top-halo rows (previous tile's last rows)
      xb_ref   : (1, P', W, C1)   bottom-halo rows (next tile's first rows)
      w_ref_g  : (kg, kg, C1, cg) group-g weights, BN scale folded, compute dtype
      b_ref    : (1, C2)          folded BN bias, f32
      o_ref    : (1, TH, W, C2)   output tile
      slab_ref : (TH+2P, Wp, C1)  persistent VMEM scratch, compute dtype
    """
    n_groups = len(ks)
    w_refs = rest[:n_groups]
    b_ref = rest[n_groups]
    o_ref = rest[n_groups + 1]
    slab_ref = rest[n_groups + 2]

    h = pl.program_id(1)
    n_h = pl.num_programs(1)

    TH, W, C1 = x_ref.shape[1], x_ref.shape[2], x_ref.shape[3]
    R, Wp, _ = slab_ref.shape
    P = max(ks) // 2
    cdt = slab_ref.dtype
    M = TH * Wp

    # ---- 1. Fill the persistent zero-padded slab (plain ref stores). ----
    if Wp > W:
        # Right gutter columns: written once per image column of tiles, never
        # dirtied afterwards (x / halo stores only touch columns [0, W)).
        @pl.when(h == 0)
        def _():
            slab_ref[:, W:, :] = jnp.zeros((R, Wp - W, C1), cdt)

    x_main = x_ref[0]                                   # (TH, W, C1) input dtype
    slab_ref[P:P + TH, 0:W, :] = x_main.astype(cdt)

    if P > 0:
        @pl.when(h > 0)
        def _():
            slab_ref[0:P, 0:W, :] = xt_ref[0].astype(cdt)

        @pl.when(h == 0)                                # top image border -> zeros
        def _():
            slab_ref[0:P, 0:W, :] = jnp.zeros((P, W, C1), cdt)

        @pl.when(h < n_h - 1)
        def _():
            slab_ref[P + TH:P + TH + P, 0:W, :] = xb_ref[0].astype(cdt)

        @pl.when(h == n_h - 1)                          # bottom image border -> zeros
        def _():
            slab_ref[P + TH:P + TH + P, 0:W, :] = jnp.zeros((P, W, C1), cdt)

    bias = b_ref[...]                                   # (1, C2) f32

    # ---- 2. Grouped convs: padded-width matmuls + XLU rolls, f32 accumulate. ----
    off = 0
    for g, kg in enumerate(ks):
        cg = c_split[g]
        pg = kg // 2
        acc = jnp.zeros((M, cg), jnp.float32)
        for dj in range(kg):                            # tap column
            part = jnp.zeros((M, cg), jnp.float32)
            for di in range(kg):                        # tap row
                r0 = P - pg + di                        # sublane-aligned row slice
                xi = slab_ref[r0:r0 + TH, :, :].reshape(M, C1)
                part = part + jnp.dot(xi, w_refs[g][di, dj],
                                      preferred_element_type=jnp.float32)
            # Horizontal shift by (dj - pg): circular roll whose wrap-around
            # reads the zero gutter, i.e. exactly the 'same' padding.
            shift = (pg - dj) % M
            if shift:
                part = pltpu.roll(part, shift, 0)
            acc = acc + part

        # ---- 3. Per-group epilogue written into the output channel slice. ----
        zg = acc.reshape(TH, Wp, cg)[:, :W, :]          # drop the gutter columns
        zg = zg + bias[0, off:off + cg]                 # folded BN bias
        zg = jnp.maximum(zg, slope * zg)                # LeakyReLU(slope), 0<slope<1
        res = x_main[:, :, off:off + cg].astype(jnp.float32)
        o_ref[0, :, :, off:off + cg] = (res + zg).astype(o_ref.dtype)
        off += cg


def mixconv_forward_nhwc(x, ws_folded, bias, ks=(1, 3), slope=0.1, *,
                         tile_h=None, compute_dtype=jnp.bfloat16):
    """Fused MixConv2d forward on NHWC input (stride 1, odd kernel sizes)."""
    N, H, W, C1 = x.shape
    C2 = int(bias.shape[-1])
    ks = tuple(int(k) for k in ks)
    assert C1 == C2, "residual in MixConv2d.forward requires c1 == c2"
    assert all(k % 2 == 1 for k in ks), "only odd kernel sizes (same padding, s=1)"
    c_split = tuple(int(w.shape[-1]) for w in ws_folded)
    assert sum(c_split) == C2 and len(c_split) == len(ks)

    P = max(ks) // 2
    if tile_h is None:                      # TODO(synk): sweep per generation
        tile_h = 8 if (H % 8 == 0 and H > 8) else H
    TH = int(tile_h)
    assert H % TH == 0, "tile_h must divide H"
    if P > 0:
        assert TH % P == 0 and H % P == 0
    n_h = H // TH

    cdt = jnp.dtype(compute_dtype)
    sub = {4: 8, 2: 16, 1: 32}[cdt.itemsize]      # sublane tile of the slab dtype
    Wp = _round_up(W + P, sub)                    # >= W+P so rolls wrap into zeros
    PH = max(P, 1)
    thp = TH // P if P > 0 else 1
    hp_last = (H // P - 1) if P > 0 else 0

    ws_c = [jnp.asarray(w, cdt) for w in ws_folded]       # MXU-native operands
    bias2d = jnp.asarray(bias, jnp.float32).reshape(1, C2)

    in_specs = [
        # current row tile of x
        pl.BlockSpec((1, TH, W, C1), lambda n, h: (n, h, 0, 0)),
        # P-row top halo (previous tile's last rows; clamped, zeroed at h == 0)
        pl.BlockSpec((1, PH, W, C1),
                     lambda n, h: (n, jnp.maximum(h * thp - 1, 0), 0, 0)),
        # P-row bottom halo (next tile's first rows; clamped, zeroed at last h)
        pl.BlockSpec((1, PH, W, C1),
                     lambda n, h: (n, jnp.minimum((h + 1) * thp, hp_last), 0, 0)),
    ]
    for w in ws_c:
        in_specs.append(pl.BlockSpec(w.shape, lambda n, h: (0, 0, 0, 0)))
    in_specs.append(pl.BlockSpec((1, C2), lambda n, h: (0, 0)))

    kernel = functools.partial(mixconv_kernel, ks=ks, c_split=c_split,
                               slope=float(slope))
    return pl.pallas_call(
        kernel,
        out_shape=jax.ShapeDtypeStruct((N, H, W, C2), x.dtype),
        grid_spec=pltpu.PrefetchScalarGridSpec(
            num_scalar_prefetch=0,
            grid=(N, n_h),
            in_specs=in_specs,
            out_specs=pl.BlockSpec((1, TH, W, C2), lambda n, h: (n, h, 0, 0)),
            scratch_shapes=[pltpu.VMEM((TH + 2 * P, Wp, C1), cdt)],
        ),
        compiler_params=pltpu.CompilerParams(
            dimension_semantics=("parallel", "arbitrary")),
    )(x, x, x, *ws_c, bias2d)


def mixconv_forward(x_nchw, ws_folded, bias, ks=(1, 3), slope=0.1, **kwargs):
    """PyTorch-facing NCHW wrapper.

    In an end-to-end NHWC pipeline call mixconv_forward_nhwc directly: each
    transpose here is a full HBM read+write of the activation around an
    otherwise single-read / single-write fused kernel.
    """
    x = jnp.transpose(x_nchw, (0, 2, 3, 1))        # NCHW -> NHWC (lane = C)
    out = mixconv_forward_nhwc(x, ws_folded, bias, ks, slope, **kwargs)
    return jnp.transpose(out, (0, 3, 1, 2))        # NHWC -> NCHW


def equal_ch_split(c2, groups):
    """Channel split used by MixConv2d(equal_ch=True)."""
    idx = np.floor(np.linspace(0.0, groups - 1e-6, c2))
    return [int((idx == g).sum()) for g in range(groups)]


def fold_bn(gamma, beta, mean, var, eps=1e-5):
    scale = gamma / jnp.sqrt(var + eps)
    bias = beta - mean * scale
    return scale, bias


def fold_params(ws, gamma, beta, mean, var, c_split, eps=1e-5):
    """Fold the BN per-channel scale into each group's conv weights."""
    scale, bias = fold_bn(gamma, beta, mean, var, eps)
    offs = np.concatenate([[0], np.cumsum(c_split)]).astype(int)
    ws_folded = [ws[g] * scale[offs[g]:offs[g + 1]] for g in range(len(ws))]
    return ws_folded, bias


def mixconv_reference(x_nchw, ws, gamma, beta, mean, var, ks=(1, 3),
                      slope=0.1, eps=1e-5):
    """Pure-JAX reference mirroring the PyTorch forward (BN in eval mode)."""
    x = jnp.transpose(x_nchw, (0, 2, 3, 1))        # NHWC
    outs = []
    for g, kg in enumerate(ks):
        p = kg // 2
        outs.append(jax.lax.conv_general_dilated(
            x, ws[g], window_strides=(1, 1), padding=((p, p), (p, p)),
            dimension_numbers=('NHWC', 'HWIO', 'NHWC'),
            precision=jax.lax.Precision.HIGHEST))
    y = jnp.concatenate(outs, axis=-1)
    scale = gamma / jnp.sqrt(var + eps)
    y = y * scale + (beta - mean * scale)
    y = jnp.where(y > 0, y, slope * y)             # LeakyReLU(slope)
    out = x + y
    return jnp.transpose(out, (0, 3, 1, 2))


if __name__ == "__main__":
    # Small deterministic test; the residual in forward() needs c1 == c2.
    N, C1, H, W = 2, 4, 16, 16
    C2 = C1
    ks = (1, 3)                                    # MixConv2d defaults
    slope = 0.1
    c_split = equal_ch_split(C2, len(ks))          # -> [2, 2]

    keys = jax.random.split(jax.random.PRNGKey(0), 1 + len(ks) + 4)
    x = jax.random.normal(keys[0], (N, C1, H, W), jnp.float32)

    # Synthetic conv weights in HWIO layout (kg, kg, C1, cg), no bias
    # (matches nn.Conv2d(..., bias=False)).
    ws = []
    for g, kg in enumerate(ks):
        fan_in = C1 * kg * kg
        ws.append(jax.random.normal(keys[1 + g], (kg, kg, C1, c_split[g]),
                                    jnp.float32) / np.sqrt(fan_in))

    kb = 1 + len(ks)
    gamma = 1.0 + 0.1 * jax.random.normal(keys[kb + 0], (C2,), jnp.float32)
    beta = 0.1 * jax.random.normal(keys[kb + 1], (C2,), jnp.float32)
    mean = 0.1 * jax.random.normal(keys[kb + 2], (C2,), jnp.float32)
    var = jax.random.uniform(keys[kb + 3], (C2,), jnp.float32,
                             minval=0.5, maxval=1.5)

    ws_folded, bias = fold_params(ws, gamma, beta, mean, var, c_split)
    ref = mixconv_reference(x, ws, gamma, beta, mean, var, ks, slope)

    # f32 compute path: tight numerical check of the kernel math.  tile_h=8
    # gives two row tiles per image so the halo exchange is exercised.
    out32 = mixconv_forward(x, ws_folded, bias, ks, slope,
                            tile_h=8, compute_dtype=jnp.float32)
    out32 = jax.block_until_ready(out32)
    assert out32.shape == (N, C2, H, W), out32.shape
    err32 = float(jnp.max(jnp.abs(out32 - ref)))
    assert jnp.allclose(out32, ref, atol=2e-3, rtol=2e-3), err32

    # bf16 compute path (production default: MXU-native operands, f32 accumulate).
    out16 = mixconv_forward(x, ws_folded, bias, ks, slope, tile_h=8)
    out16 = jax.block_until_ready(out16)
    assert out16.shape == (N, C2, H, W), out16.shape
    err16 = float(jnp.max(jnp.abs(out16 - ref)))
    assert jnp.allclose(out16, ref, atol=7e-2, rtol=7e-2), err16

    print("KERNEL_OK")
</pallas_src>

<mosaic_0001>
module attributes {stable_mosaic.version = 11 : i64} {
  func.func @mixconv_kernel(%arg0: i32, %arg1: i32, %arg2: memref<1x8x16x4xf32, #tpu.memory_space<vmem>>, %arg3: memref<1x1x16x4xf32, #tpu.memory_space<vmem>>, %arg4: memref<1x1x16x4xf32, #tpu.memory_space<vmem>>, %arg5: memref<1x1x4x2xf32, #tpu.memory_space<vmem>>, %arg6: memref<3x3x4x2xf32, #tpu.memory_space<vmem>>, %arg7: memref<1x4xf32, #tpu.memory_space<vmem>>, %arg8: memref<1x8x16x4xf32, #tpu.memory_space<vmem>>, %arg9: memref<10x24x4xf32, #tpu.memory_space<vmem>>) attributes {dimension_semantics = [#tpu.dimension_semantics<parallel>, #tpu.dimension_semantics<arbitrary>], iteration_bounds = array<i64: 2, 2>, scalar_prefetch = 0 : i64, scratch_operands = 1 : i64, tpu.core_type = #tpu.core_type<tc>, window_params = [{transform_indices = @transform_0, window_bounds = array<i64: 1, 8, 16, 4>}, {transform_indices = @transform_1, window_bounds = array<i64: 1, 1, 16, 4>}, {transform_indices = @transform_2, window_bounds = array<i64: 1, 1, 16, 4>}, {pipeline_mode = #tpu.pipeline_mode<synchronous>, transform_indices = @transform_3, window_bounds = array<i64: 1, 1, 4, 2>}, {pipeline_mode = #tpu.pipeline_mode<synchronous>, transform_indices = @transform_4, window_bounds = array<i64: 3, 3, 4, 2>}, {pipeline_mode = #tpu.pipeline_mode<synchronous>, transform_indices = @transform_5, window_bounds = array<i64: 1, 4>}, {transform_indices = @transform_6, window_bounds = array<i64: 1, 8, 16, 4>}]} {
    %c0_i32 = arith.constant 0 : i32
    %0 = arith.cmpi eq, %arg1, %c0_i32 : i32
    %1 = arith.extui %0 : i1 to i32
    %c0_i32_0 = arith.constant 0 : i32
    %2 = arith.cmpi ne, %1, %c0_i32_0 : i32
    scf.if %2 {
      %cst_110 = arith.constant 0.000000e+00 : f32
      %121 = vector.broadcast %cst_110 : f32 to vector<10x8x4xf32>
      %c0_111 = arith.constant 0 : index
      %c16 = arith.constant 16 : index
      %c0_112 = arith.constant 0 : index
      %122 = vector.load %arg9[%c0_111, %c16, %c0_112] : memref<10x24x4xf32, #tpu.memory_space<vmem>>, vector<10x8x4xf32>
      tpu.vector_store %arg9[%c0_111, %c16, %c0_112], %121 {strides = array<i32>} : memref<10x24x4xf32, #tpu.memory_space<vmem>>, vector<10x8x4xf32>,
    } else {
    }
    %c0 = arith.constant 0 : index
    %c0_1 = arith.constant 0 : index
    %c0_2 = arith.constant 0 : index
    %c0_3 = arith.constant 0 : index
    %3 = vector.load %arg2[%c0, %c0_1, %c0_2, %c0_3] : memref<1x8x16x4xf32, #tpu.memory_space<vmem>>, vector<1x8x16x4xf32>
    %4 = vector.shape_cast %3 : vector<1x8x16x4xf32> to vector<8x16x4xf32>
    %c1 = arith.constant 1 : index
    %c0_4 = arith.constant 0 : index
    %c0_5 = arith.constant 0 : index
    %5 = vector.load %arg9[%c1, %c0_4, %c0_5] : memref<10x24x4xf32, #tpu.memory_space<vmem>>, vector<8x16x4xf32>
    tpu.vector_store %arg9[%c1, %c0_4, %c0_5], %4 {strides = array<i32>} : memref<10x24x4xf32, #tpu.memory_space<vmem>>, vector<8x16x4xf32>,
    %c0_i32_6 = arith.constant 0 : i32
    %6 = arith.cmpi sgt, %arg1, %c0_i32_6 : i32
    %7 = arith.extui %6 : i1 to i32
    %c0_i32_7 = arith.constant 0 : i32
    %8 = arith.cmpi ne, %7, %c0_i32_7 : i32
    scf.if %8 {
      %c0_110 = arith.constant 0 : index
      %c0_111 = arith.constant 0 : index
      %c0_112 = arith.constant 0 : index
      %c0_113 = arith.constant 0 : index
      %121 = vector.load %arg3[%c0_110, %c0_111, %c0_112, %c0_113] : memref<1x1x16x4xf32, #tpu.memory_space<vmem>>, vector<1x1x16x4xf32>
      %122 = vector.shape_cast %121 : vector<1x1x16x4xf32> to vector<1x16x4xf32>
      %c0_114 = arith.constant 0 : index
      %c0_115 = arith.constant 0 : index
      %c0_116 = arith.constant 0 : index
      %123 = vector.load %arg9[%c0_114, %c0_115, %c0_116] : memref<10x24x4xf32, #tpu.memory_space<vmem>>, vector<1x16x4xf32>
      tpu.vector_store %arg9[%c0_114, %c0_115, %c0_116], %122 {strides = array<i32>} : memref<10x24x4xf32, #tpu.memory_space<vmem>>, vector<1x16x4xf32>,
    } else {
    }
    %c0_i32_8 = arith.constant 0 : i32
    %9 = arith.cmpi eq, %arg1, %c0_i32_8 : i32
    %10 = arith.extui %9 : i1 to i32
    %c0_i32_9 = arith.constant 0 : i32
    %11 = arith.cmpi ne, %10, %c0_i32_9 : i32
    scf.if %11 {
      %cst_110 = arith.constant 0.000000e+00 : f32
      %121 = vector.broadcast %cst_110 : f32 to vector<1x16x4xf32>
      %c0_111 = arith.constant 0 : index
      %c0_112 = arith.constant 0 : index
      %c0_113 = arith.constant 0 : index
      %122 = vector.load %arg9[%c0_111, %c0_112, %c0_113] : memref<10x24x4xf32, #tpu.memory_space<vmem>>, vector<1x16x4xf32>
      tpu.vector_store %arg9[%c0_111, %c0_112, %c0_113], %121 {strides = array<i32>} : memref<10x24x4xf32, #tpu.memory_space<vmem>>, vector<1x16x4xf32>,
    } else {
    }
    %c1_i32 = arith.constant 1 : i32
    %12 = arith.cmpi slt, %arg1, %c1_i32 : i32
    %13 = arith.extui %12 : i1 to i32
    %c0_i32_10 = arith.constant 0 : i32
    %14 = arith.cmpi ne, %13, %c0_i32_10 : i32
    scf.if %14 {
      %c0_110 = arith.constant 0 : index
      %c0_111 = arith.constant 0 : index
      %c0_112 = arith.constant 0 : index
      %c0_113 = arith.constant 0 : index
      %121 = vector.load %arg4[%c0_110, %c0_111, %c0_112, %c0_113] : memref<1x1x16x4xf32, #tpu.memory_space<vmem>>, vector<1x1x16x4xf32>
      %122 = vector.shape_cast %121 : vector<1x1x16x4xf32> to vector<1x16x4xf32>
      %c9 = arith.constant 9 : index
      %c0_114 = arith.constant 0 : index
      %c0_115 = arith.constant 0 : index
      %123 = vector.load %arg9[%c9, %c0_114, %c0_115] : memref<10x24x4xf32, #tpu.memory_space<vmem>>, vector<1x16x4xf32>
      tpu.vector_store %arg9[%c9, %c0_114, %c0_115], %122 {strides = array<i32>} : memref<10x24x4xf32, #tpu.memory_space<vmem>>, vector<1x16x4xf32>,
    } else {
    }
    %c1_i32_11 = arith.constant 1 : i32
    %15 = arith.cmpi eq, %arg1, %c1_i32_11 : i32
    %16 = arith.extui %15 : i1 to i32
    %c0_i32_12 = arith.constant 0 : i32
    %17 = arith.cmpi ne, %16, %c0_i32_12 : i32
    scf.if %17 {
      %cst_110 = arith.constant 0.000000e+00 : f32
      %121 = vector.broadcast %cst_110 : f32 to vector<1x16x4xf32>
      %c9 = arith.constant 9 : index
      %c0_111 = arith.constant 0 : index
      %c0_112 = arith.constant 0 : index
      %122 = vector.load %arg9[%c9, %c0_111, %c0_112] : memref<10x24x4xf32, #tpu.memory_space<vmem>>, vector<1x16x4xf32>
      tpu.vector_store %arg9[%c9, %c0_111, %c0_112], %121 {strides = array<i32>} : memref<10x24x4xf32, #tpu.memory_space<vmem>>, vector<1x16x4xf32>,
    } else {
    }
    %c0_13 = arith.constant 0 : index
    %c0_14 = arith.constant 0 : index
    %18 = vector.load %arg7[%c0_13, %c0_14] : memref<1x4xf32, #tpu.memory_space<vmem>>, vector<1x4xf32>
    %cst = arith.constant 0.000000e+00 : f32
    %19 = vector.broadcast %cst : f32 to vector<192x2xf32>
    %cst_15 = arith.constant 0.000000e+00 : f32
    %20 = vector.broadcast %cst_15 : f32 to vector<192x2xf32>
    %c1_16 = arith.constant 1 : index
    %c0_17 = arith.constant 0 : index
    %c0_18 = arith.constant 0 : index
    %21 = vector.load %arg9[%c1_16, %c0_17, %c0_18] : memref<10x24x4xf32, #tpu.memory_space<vmem>>, vector<8x24x4xf32>
    %22 = vector.shape_cast %21 : vector<8x24x4xf32> to vector<192x4xf32>
    %c0_19 = arith.constant 0 : index
    %c0_20 = arith.constant 0 : index
    %c0_21 = arith.constant 0 : index
    %c0_22 = arith.constant 0 : index
    %23 = vector.load %arg5[%c0_19, %c0_20, %c0_21, %c0_22] : memref<1x1x4x2xf32, #tpu.memory_space<vmem>>, vector<1x1x4x2xf32>
    %24 = vector.shape_cast %23 : vector<1x1x4x2xf32> to vector<4x2xf32>
    %cst_23 = arith.constant dense<0.000000e+00> : vector<192x2xf32>
    %25 = tpu.matmul %22, %24, %cst_23 {dimension_numbers = #tpu.dot_dimension_numbers<[1], [0], [0], [1], [0, 0, 1, 1], [], []>} : vector<192x4xf32>, vector<4x2xf32>, vector<192x2xf32> -> vector<192x2xf32>
    %26 = arith.addf %20, %25 : vector<192x2xf32>
    %27 = arith.addf %19, %26 : vector<192x2xf32>
    %28 = vector.shape_cast %27 : vector<192x2xf32> to vector<8x24x2xf32>
    %29 = vector.extract_strided_slice %28 {offsets = [0, 0, 0], sizes = [8, 16, 2], strides = [1, 1, 1]} : vector<8x24x2xf32> to vector<8x16x2xf32>
    %30 = vector.extract_strided_slice %18 {offsets = [0, 0], sizes = [1, 2], strides = [1, 1]} : vector<1x4xf32> to vector<1x2xf32>
    %31 = vector.shape_cast %30 : vector<1x2xf32> to vector<2xf32>
    %32 = vector.shape_cast %31 : vector<2xf32> to vector<1x1x2xf32>
    %33 = vector.broadcast %32 : vector<1x1x2xf32> to vector<8x16x2xf32>
    %34 = arith.addf %29, %33 : vector<8x16x2xf32>
    %cst_24 = arith.constant 1.000000e-01 : f32
    %35 = vector.broadcast %cst_24 : f32 to vector<8x16x2xf32>
    %36 = arith.mulf %35, %34 : vector<8x16x2xf32>
    %37 = arith.maximumf %34, %36 : vector<8x16x2xf32>
    %38 = vector.extract_strided_slice %4 {offsets = [0, 0, 0], sizes = [8, 16, 2], strides = [1, 1, 1]} : vector<8x16x4xf32> to vector<8x16x2xf32>
    %39 = arith.addf %38, %37 : vector<8x16x2xf32>
    %c0_25 = arith.constant 0 : index
    %c0_26 = arith.constant 0 : index
    %c0_27 = arith.constant 0 : index
    %c0_28 = arith.constant 0 : index
    %40 = vector.load %arg8[%c0_25, %c0_26, %c0_27, %c0_28] : memref<1x8x16x4xf32, #tpu.memory_space<vmem>>, vector<1x8x16x2xf32>
    %41 = vector.shape_cast %40 : vector<1x8x16x2xf32> to vector<8x16x2xf32>
    %42 = vector.shape_cast %39 : vector<8x16x2xf32> to vector<1x8x16x2xf32>
    tpu.vector_store %arg8[%c0_25, %c0_26, %c0_27, %c0_28], %42 {strides = array<i32>} : memref<1x8x16x4xf32, #tpu.memory_space<vmem>>, vector<1x8x16x2xf32>,
    %cst_29 = arith.constant 0.000000e+00 : f32
    %43 = vector.broadcast %cst_29 : f32 to vector<192x2xf32>
    %cst_30 = arith.constant 0.000000e+00 : f32
    %44 = vector.broadcast %cst_30 : f32 to vector<192x2xf32>
    %c0_31 = arith.constant 0 : index
    %c0_32 = arith.constant 0 : index
    %c0_33 = arith.constant 0 : index
    %45 = vector.load %arg9[%c0_31, %c0_32, %c0_33] : memref<10x24x4xf32, #tpu.memory_space<vmem>>, vector<8x24x4xf32>
    %46 = vector.shape_cast %45 : vector<8x24x4xf32> to vector<192x4xf32>
    %c0_34 = arith.constant 0 : index
    %c0_35 = arith.constant 0 : index
    %c0_36 = arith.constant 0 : index
    %c0_37 = arith.constant 0 : index
    %47 = vector.load %arg6[%c0_34, %c0_35, %c0_36, %c0_37] : memref<3x3x4x2xf32, #tpu.memory_space<vmem>>, vector<1x1x4x2xf32>
    %48 = vector.shape_cast %47 : vector<1x1x4x2xf32> to vector<4x2xf32>
    %cst_38 = arith.constant dense<0.000000e+00> : vector<192x2xf32>
    %49 = tpu.matmul %46, %48, %cst_38 {dimension_numbers = #tpu.dot_dimension_numbers<[1], [0], [0], [1], [0, 0, 1, 1], [], []>} : vector<192x4xf32>, vector<4x2xf32>, vector<192x2xf32> -> vector<192x2xf32>
    %50 = arith.addf %44, %49 : vector<192x2xf32>
    %c1_39 = arith.constant 1 : index
    %c0_40 = arith.constant 0 : index
    %c0_41 = arith.constant 0 : index
    %51 = vector.load %arg9[%c1_39, %c0_40, %c0_41] : memref<10x24x4xf32, #tpu.memory_space<vmem>>, vector<8x24x4xf32>
    %52 = vector.shape_cast %51 : vector<8x24x4xf32> to vector<192x4xf32>
    %c1_42 = arith.constant 1 : index
    %c0_43 = arith.constant 0 : index
    %c0_44 = arith.constant 0 : index
    %c0_45 = arith.constant 0 : index
    %53 = vector.load %arg6[%c1_42, %c0_43, %c0_44, %c0_45] : memref<3x3x4x2xf32, #tpu.memory_space<vmem>>, vector<1x1x4x2xf32>
    %54 = vector.shape_cast %53 : vector<1x1x4x2xf32> to vector<4x2xf32>
    %cst_46 = arith.constant dense<0.000000e+00> : vector<192x2xf32>
    %55 = tpu.matmul %52, %54, %cst_46 {dimension_numbers = #tpu.dot_dimension_numbers<[1], [0], [0], [1], [0, 0, 1, 1], [], []>} : vector<192x4xf32>, vector<4x2xf32>, vector<192x2xf32> -> vector<192x2xf32>
    %56 = arith.addf %50, %55 : vector<192x2xf32>
    %c2 = arith.constant 2 : index
    %c0_47 = arith.constant 0 : index
    %c0_48 = arith.constant 0 : index
    %57 = vector.load %arg9[%c2, %c0_47, %c0_48] : memref<10x24x4xf32, #tpu.memory_space<vmem>>, vector<8x24x4xf32>
    %58 = vector.shape_cast %57 : vector<8x24x4xf32> to vector<192x4xf32>
    %c2_49 = arith.constant 2 : index
    %c0_50 = arith.constant 0 : index
    %c0_51 = arith.constant 0 : index
    %c0_52 = arith.constant 0 : index
    %59 = vector.load %arg6[%c2_49, %c0_50, %c0_51, %c0_52] : memref<3x3x4x2xf32, #tpu.memory_space<vmem>>, vector<1x1x4x2xf32>
    %60 = vector.shape_cast %59 : vector<1x1x4x2xf32> to vector<4x2xf32>
    %cst_53 = arith.constant dense<0.000000e+00> : vector<192x2xf32>
    %61 = tpu.matmul %58, %60, %cst_53 {dimension_numbers = #tpu.dot_dimension_numbers<[1], [0], [0], [1], [0, 0, 1, 1], [], []>} : vector<192x4xf32>, vector<4x2xf32>, vector<192x2xf32> -> vector<192x2xf32>
    %62 = arith.addf %56, %61 : vector<192x2xf32>
    %c1_i32_54 = arith.constant 1 : i32
    %63 = tpu.dynamic_rotate %62 by %c1_i32_54 dim 0 : vector<192x2xf32>, i32 -> vector<192x2xf32>
    %64 = arith.addf %43, %63 : vector<192x2xf32>
    %cst_55 = arith.constant 0.000000e+00 : f32
    %65 = vector.broadcast %cst_55 : f32 to vector<192x2xf32>
    %c0_56 = arith.constant 0 : index
    %c0_57 = arith.constant 0 : index
    %c0_58 = arith.constant 0 : index
    %66 = vector.load %arg9[%c0_56, %c0_57, %c0_58] : memref<10x24x4xf32, #tpu.memory_space<vmem>>, vector<8x24x4xf32>
    %67 = vector.shape_cast %66 : vector<8x24x4xf32> to vector<192x4xf32>
    %c0_59 = arith.constant 0 : index
    %c1_60 = arith.constant 1 : index
    %c0_61 = arith.constant 0 : index
    %c0_62 = arith.constant 0 : index
    %68 = vector.load %arg6[%c0_59, %c1_60, %c0_61, %c0_62] : memref<3x3x4x2xf32, #tpu.memory_space<vmem>>, vector<1x1x4x2xf32>
    %69 = vector.shape_cast %68 : vector<1x1x4x2xf32> to vector<4x2xf32>
    %cst_63 = arith.constant dense<0.000000e+00> : vector<192x2xf32>
    %70 = tpu.matmul %67, %69, %cst_63 {dimension_numbers = #tpu.dot_dimension_numbers<[1], [0], [0], [1], [0, 0, 1, 1], [], []>} : vector<192x4xf32>, vector<4x2xf32>, vector<192x2xf32> -> vector<192x2xf32>
    %71 = arith.addf %65, %70 : vector<192x2xf32>
    %c1_64 = arith.constant 1 : index
    %c0_65 = arith.constant 0 : index
    %c0_66 = arith.constant 0 : index
    %72 = vector.load %arg9[%c1_64, %c0_65, %c0_66] : memref<10x24x4xf32, #tpu.memory_space<vmem>>, vector<8x24x4xf32>
    %73 = vector.shape_cast %72 : vector<8x24x4xf32> to vector<192x4xf32>
    %c1_67 = arith.constant 1 : index
    %c1_68 = arith.constant 1 : index
    %c0_69 = arith.constant 0 : index
    %c0_70 = arith.constant 0 : index
    %74 = vector.load %arg6[%c1_67, %c1_68, %c0_69, %c0_70] : memref<3x3x4x2xf32, #tpu.memory_space<vmem>>, vector<1x1x4x2xf32>
    %75 = vector.shape_cast %74 : vector<1x1x4x2xf32> to vector<4x2xf32>
    %cst_71 = arith.constant dense<0.000000e+00> : vector<192x2xf32>
    %76 = tpu.matmul %73, %75, %cst_71 {dimension_numbers = #tpu.dot_dimension_numbers<[1], [0], [0], [1], [0, 0, 1, 1], [], []>} : vector<192x4xf32>, vector<4x2xf32>, vector<192x2xf32> -> vector<192x2xf32>
    %77 = arith.addf %71, %76 : vector<192x2xf32>
    %c2_72 = arith.constant 2 : index
    %c0_73 = arith.constant 0 : index
    %c0_74 = arith.constant 0 : index
    %78 = vector.load %arg9[%c2_72, %c0_73, %c0_74] : memref<10x24x4xf32, #tpu.memory_space<vmem>>, vector<8x24x4xf32>
    %79 = vector.shape_cast %78 : vector<8x24x4xf32> to vector<192x4xf32>
    %c2_75 = arith.constant 2 : index
    %c1_76 = arith.constant 1 : index
    %c0_77 = arith.constant 0 : index
    %c0_78 = arith.constant 0 : index
    %80 = vector.load %arg6[%c2_75, %c1_76, %c0_77, %c0_78] : memref<3x3x4x2xf32, #tpu.memory_space<vmem>>, vector<1x1x4x2xf32>
    %81 = vector.shape_cast %80 : vector<1x1x4x2xf32> to vector<4x2xf32>
    %cst_79 = arith.constant dense<0.000000e+00> : vector<192x2xf32>
    %82 = tpu.matmul %79, %81, %cst_79 {dimension_numbers = #tpu.dot_dimension_numbers<[1], [0], [0], [1], [0, 0, 1, 1], [], []>} : vector<192x4xf32>, vector<4x2xf32>, vector<192x2xf32> -> vector<192x2xf32>
    %83 = arith.addf %77, %82 : vector<192x2xf32>
    %84 = arith.addf %64, %83 : vector<192x2xf32>
    %cst_80 = arith.constant 0.000000e+00 : f32
    %85 = vector.broadcast %cst_80 : f32 to vector<192x2xf32>
    %c0_81 = arith.constant 0 : index
    %c0_82 = arith.constant 0 : index
    %c0_83 = arith.constant 0 : index
    %86 = vector.load %arg9[%c0_81, %c0_82, %c0_83] : memref<10x24x4xf32, #tpu.memory_space<vmem>>, vector<8x24x4xf32>
    %87 = vector.shape_cast %86 : vector<8x24x4xf32> to vector<192x4xf32>
    %c0_84 = arith.constant 0 : index
    %c2_85 = arith.constant 2 : index
    %c0_86 = arith.constant 0 : index
    %c0_87 = arith.constant 0 : index
    %88 = vector.load %arg6[%c0_84, %c2_85, %c0_86, %c0_87] : memref<3x3x4x2xf32, #tpu.memory_space<vmem>>, vector<1x1x4x2xf32>
    %89 = vector.shape_cast %88 : vector<1x1x4x2xf32> to vector<4x2xf32>
    %cst_88 = arith.constant dense<0.000000e+00> : vector<192x2xf32>
    %90 = tpu.matmul %87, %89, %cst_88 {dimension_numbers = #tpu.dot_dimension_numbers<[1], [0], [0], [1], [0, 0, 1, 1], [], []>} : vector<192x4xf32>, vector<4x2xf32>, vector<192x2xf32> -> vector<192x2xf32>
    %91 = arith.addf %85, %90 : vector<192x2xf32>
    %c1_89 = arith.constant 1 : index
    %c0_90 = arith.constant 0 : index
    %c0_91 = arith.constant 0 : index
    %92 = vector.load %arg9[%c1_89, %c0_90, %c0_91] : memref<10x24x4xf32, #tpu.memory_space<vmem>>, vector<8x24x4xf32>
    %93 = vector.shape_cast %92 : vector<8x24x4xf32> to vector<192x4xf32>
    %c1_92 = arith.constant 1 : index
    %c2_93 = arith.constant 2 : index
    %c0_94 = arith.constant 0 : index
    %c0_95 = arith.constant 0 : index
    %94 = vector.load %arg6[%c1_92, %c2_93, %c0_94, %c0_95] : memref<3x3x4x2xf32, #tpu.memory_space<vmem>>, vector<1x1x4x2xf32>
    %95 = vector.shape_cast %94 : vector<1x1x4x2xf32> to vector<4x2xf32>
    %cst_96 = arith.constant dense<0.000000e+00> : vector<192x2xf32>
    %96 = tpu.matmul %93, %95, %cst_96 {dimension_numbers = #tpu.dot_dimension_numbers<[1], [0], [0], [1], [0, 0, 1, 1], [], []>} : vector<192x4xf32>, vector<4x2xf32>, vector<192x2xf32> -> vector<192x2xf32>
    %97 = arith.addf %91, %96 : vector<192x2xf32>
    %c2_97 = arith.constant 2 : index
    %c0_98 = arith.constant 0 : index
    %c0_99 = arith.constant 0 : index
    %98 = vector.load %arg9[%c2_97, %c0_98, %c0_99] : memref<10x24x4xf32, #tpu.memory_space<vmem>>, vector<8x24x4xf32>
    %99 = vector.shape_cast %98 : vector<8x24x4xf32> to vector<192x4xf32>
    %c2_100 = arith.constant 2 : index
    %c2_101 = arith.constant 2 : index
    %c0_102 = arith.constant 0 : index
    %c0_103 = arith.constant 0 : index
    %100 = vector.load %arg6[%c2_100, %c2_101, %c0_102, %c0_103] : memref<3x3x4x2xf32, #tpu.memory_space<vmem>>, vector<1x1x4x2xf32>
    %101 = vector.shape_cast %100 : vector<1x1x4x2xf32> to vector<4x2xf32>
    %cst_104 = arith.constant dense<0.000000e+00> : vector<192x2xf32>
    %102 = tpu.matmul %99, %101, %cst_104 {dimension_numbers = #tpu.dot_dimension_numbers<[1], [0], [0], [1], [0, 0, 1, 1], [], []>} : vector<192x4xf32>, vector<4x2xf32>, vector<192x2xf32> -> vector<192x2xf32>
    %103 = arith.addf %97, %102 : vector<192x2xf32>
    %c191_i32 = arith.constant 191 : i32
    %104 = tpu.dynamic_rotate %103 by %c191_i32 dim 0 : vector<192x2xf32>, i32 -> vector<192x2xf32>
    %105 = arith.addf %84, %104 : vector<192x2xf32>
    %106 = vector.shape_cast %105 : vector<192x2xf32> to vector<8x24x2xf32>
    %107 = vector.extract_strided_slice %106 {offsets = [0, 0, 0], sizes = [8, 16, 2], strides = [1, 1, 1]} : vector<8x24x2xf32> to vector<8x16x2xf32>
    %108 = vector.extract_strided_slice %18 {offsets = [0, 2], sizes = [1, 2], strides = [1, 1]} : vector<1x4xf32> to vector<1x2xf32>
    %109 = vector.shape_cast %108 : vector<1x2xf32> to vector<2xf32>
    %110 = vector.shape_cast %109 : vector<2xf32> to vector<1x1x2xf32>
    %111 = vector.broadcast %110 : vector<1x1x2xf32> to vector<8x16x2xf32>
    %112 = arith.addf %107, %111 : vector<8x16x2xf32>
    %cst_105 = arith.constant 1.000000e-01 : f32
    %113 = vector.broadcast %cst_105 : f32 to vector<8x16x2xf32>
    %114 = arith.mulf %113, %112 : vector<8x16x2xf32>
    %115 = arith.maximumf %112, %114 : vector<8x16x2xf32>
    %116 = vector.extract_strided_slice %4 {offsets = [0, 0, 2], sizes = [8, 16, 2], strides = [1, 1, 1]} : vector<8x16x4xf32> to vector<8x16x2xf32>
    %117 = arith.addf %116, %115 : vector<8x16x2xf32>
    %c0_106 = arith.constant 0 : index
    %c0_107 = arith.constant 0 : index
    %c0_108 = arith.constant 0 : index
    %c2_109 = arith.constant 2 : index
    %118 = vector.load %arg8[%c0_106, %c0_107, %c0_108, %c2_109] : memref<1x8x16x4xf32, #tpu.memory_space<vmem>>, vector<1x8x16x2xf32>
    %119 = vector.shape_cast %118 : vector<1x8x16x2xf32> to vector<8x16x2xf32>
    %120 = vector.shape_cast %117 : vector<8x16x2xf32> to vector<1x8x16x2xf32>
    tpu.vector_store %arg8[%c0_106, %c0_107, %c0_108, %c2_109], %120 {strides = array<i32>} : memref<1x8x16x4xf32, #tpu.memory_space<vmem>>, vector<1x8x16x2xf32>,
    return
  }
  func.func @transform_0(%arg0: i32, %arg1: i32) -> (i32, i32, i32, i32) {
    %c0_i32 = arith.constant 0 : i32
    %c0_i32_0 = arith.constant 0 : i32
    %c0_i32_1 = arith.constant 0 : i32
    return %arg0, %arg1, %c0_i32, %c0_i32_0 : i32, i32, i32, i32
  }
  func.func @transform_1(%arg0: i32, %arg1: i32) -> (i32, i32, i32, i32) {
    %c8_i32 = arith.constant 8 : i32
    %0 = arith.muli %arg1, %c8_i32 : i32
    %c1_i32 = arith.constant 1 : i32
    %1 = arith.subi %0, %c1_i32 : i32
    %c0_i32 = arith.constant 0 : i32
    %2 = arith.maxsi %1, %c0_i32 : i32
    %c0_i32_0 = arith.constant 0 : i32
    %c0_i32_1 = arith.constant 0 : i32
    %c0_i32_2 = arith.constant 0 : i32
    return %arg0, %2, %c0_i32_0, %c0_i32_1 : i32, i32, i32, i32
  }
  func.func @transform_2(%arg0: i32, %arg1: i32) -> (i32, i32, i32, i32) {
    %c1_i32 = arith.constant 1 : i32
    %0 = arith.addi %arg1, %c1_i32 : i32
    %c8_i32 = arith.constant 8 : i32
    %1 = arith.muli %0, %c8_i32 : i32
    %c15_i32 = arith.constant 15 : i32
    %2 = arith.minsi %1, %c15_i32 : i32
    %c0_i32 = arith.constant 0 : i32
    %c0_i32_0 = arith.constant 0 : i32
    %c0_i32_1 = arith.constant 0 : i32
    return %arg0, %2, %c0_i32, %c0_i32_0 : i32, i32, i32, i32
  }
  func.func @transform_3(%arg0: i32, %arg1: i32) -> (i32, i32, i32, i32) {
    %c0_i32 = arith.constant 0 : i32
    %c0_i32_0 = arith.constant 0 : i32
    %c0_i32_1 = arith.constant 0 : i32
    %c0_i32_2 = arith.constant 0 : i32
    %c0_i32_3 = arith.constant 0 : i32
    return %c0_i32, %c0_i32_0, %c0_i32_1, %c0_i32_2 : i32, i32, i32, i32
  }
  func.func @transform_4(%arg0: i32, %arg1: i32) -> (i32, i32, i32, i32) {
    %c0_i32 = arith.constant 0 : i32
    %c0_i32_0 = arith.constant 0 : i32
    %c0_i32_1 = arith.constant 0 : i32
    %c0_i32_2 = arith.constant 0 : i32
    %c0_i32_3 = arith.constant 0 : i32
    return %c0_i32, %c0_i32_0, %c0_i32_1, %c0_i32_2 : i32, i32, i32, i32
  }
  func.func @transform_5(%arg0: i32, %arg1: i32) -> (i32, i32) {
    %c0_i32 = arith.constant 0 : i32
    %c0_i32_0 = arith.constant 0 : i32
    %c0_i32_1 = arith.constant 0 : i32
    return %c0_i32, %c0_i32_0 : i32, i32
  }
  func.func @transform_6(%arg0: i32, %arg1: i32) -> (i32, i32, i32, i32) {
    %c0_i32 = arith.constant 0 : i32
    %c0_i32_0 = arith.constant 0 : i32
    %c0_i32_1 = arith.constant 0 : i32
    return %arg0, %arg1, %c0_i32, %c0_i32_0 : i32, i32, i32, i32
  }
}

</mosaic_0001>

<bundles_post_ra>
// kernel: tpu_custom_call.1
= control target key start
LH: loop header
LB: loop body
LE: loop exit
PB: predicated region body
PF: predicated region fallthrough
CT: control target
= control target key end

     0   :  { %s4388_s21 = smov 0   ;;  %s4390_s22 = smov 0   ;;  %s5669_s0 = inlined_call_operand.vmem [shape: f32[2,16,16,4], index: 0, kind: input, shape index: {}]   ;;  %s5670_s1 = inlined_call_operand.vmem [shape: f32[2,16,16,4], index: 1, kind: input, shape index: {}]   ;;  %s5671_s2 = inlined_call_operand.vmem [shape: f32[2,16,16,4], index: 2, kind: input, shape index: {}]   ;;  %s5672_s3 = inlined_call_operand.vmem [shape: f32[1,1,4,2], index: 3, kind: input, shape index: {}]   ;;  %s5673_s4 = inlined_call_operand.vmem [shape: f32[3,3,4,2], index: 4, kind: input, shape index: {}]   ;;  %s5674_s5 = inlined_call_operand.vmem [shape: f32[1,4], index: 5, kind: input, shape index: {}]   ;;  %s5675_s6 = inlined_call_operand.vmem [shape: f32[2,16,16,4], index: 6, kind: output, shape index: {}]  }
   0x1   :  { %5688 = sst [smem:[#allocation15_spill]] %s5669_s0  ;;  %s4392_s23 = smov 0  }
   0x2   :  { %s4394_s24 = smov 0   ;;  %s4396_s25 = smov 0  }
   0x3 LB: > { %s25_s26 = sadd.s32 1, %s4338_s23  ;;  %s28_s27 = sadd.s32 1, %s4342_s24  ;;  %s4346_s25 = sphi %s4396_s25, %s16_s25   ;;  %s4342_s24 = sphi %s4394_s24, %s5717_s24   ;;  %s4338_s23 = sphi %s4392_s23, %s5716_s23   ;;  %s4334_s22 = sphi %s4390_s22, %s5715_s22   ;;  %s4330_s21 = sphi %s4388_s21, %s5714_s21  }
   0x4   : > { %p26_p0 = scmp.ge.s32.totalorder %s25_s26, 2  ;;  %p3333_p1 = scmp.ge.s32.totalorder %s4346_s25, 1 }
   0x5   : > { %p298_p2 = scmp.lt.s32.totalorder %s4346_s25, 5 }
   0x6   : > { %s5719_s26 = smov (%p26_p0, %s25_s26), 0  ;;  %s5721_s27 = smov (!%p26_p0, %s28_s27), %s4342_s24 }
   0x7   : > { %p299_p3 = pnand %p3333_p1, %p298_p2  ;;  %p30_p4 = scmp.ge.s32.totalorder %s5721_s27, 2 }
   0x9   : > { %s5723_s27 = smov (%p30_p4, %s5721_s27), 0  ;;  %302 = sbr.rel (%p299_p3) target bundleno = 651 (0x28b), region = 44 }
   0xe   : > { %s3334_s28 = sshll.u32 %s4330_s21, 3  ;;  %p365_p5 = scmp.lt.s32.totalorder %s4334_s22, 1 }
   0xf   : > { %p367_p6 = scmp.lt.s32.totalorder %s3334_s28, 15  ;;  %s3339_s29 = sadd.s32 4294967295, %s3334_s28 }
  0x10   : > { %s5725_s22 = smov (!%p365_p5, %s4334_s22), 1  ;;  %p377_p7 = scmp.gt.s32.totalorder %s3339_s29, 0 }
  0x11   : > { %s368_s30 = scalar_select %p367_p6, %s3334_s28, 15 }
  0x12   : > { %s3336_s7 = sshll.u32 %s5725_s22, 5  ;;  %p3340_p8 = scmp.lt.s32.totalorder %s3339_s29, 15 }
  0x13   : > { %s3335_s8 = sshll.u32 %s368_s30, 1  ;;  %s3632_s10 = sadd.s32 8, %s3334_s28 }
  0x14   : > { %s371_s9 = sadd.s32 %s3336_s7, %s3335_s8  ;;  %p394_p9 = scmp.lt.s32.totalorder %s3632_s10, 15 }
  0x15   : > { %s3337_s11 = sshll.u32 %s371_s9, 3  ;;  %s5689_s0 = sld [smem:[#allocation15_spill]] }
  0x16   : > { %s4429_s17 = scalar_lea.vmem %s5675_s6, %s3337_s11  ;;  %s5727_s29 = smov (!%p377_p7, %s3339_s29), 0 }
  0x17   : > { %s5729_s10 = smov (!%p394_p9, %s3632_s10), 15  ;;  %s5731_s29 = smov (!%p3340_p8, %s5727_s29), 15 }
  0x18   : > { %s5733_s10 = smov (!%p394_p9, %s5729_s10), 15  ;;  %s3345_s18 = sshll.u32 %s5731_s29, 1 }
  0x19   : > { %s385_s19 = sadd.s32 %s3345_s18, %s3336_s7  ;;  %s3352_s20 = sshll.u32 %s5733_s10, 1 }
  0x1a   : > { %s3347_s22 = sshll.u32 %s385_s19, 3  ;;  %s402_s28 = sadd.s32 %s3352_s20, %s3336_s7 }
  0x1b   : > { %s4424_s14 = scalar_lea.vmem %s5689_s0, %s3337_s11  ;;  %s4434_s9 = scalar_lea.vmem %s5670_s1, %s3347_s22 }
  0x1c   : > { %s3354_s12 = sshll.u32 %s402_s28, 3  ;;  %p3359_p10 = scmp.ne.s32.totalorder %s4330_s21, 0 }
  0x1d   : > { %s4439_s11 = scalar_lea.vmem %s5671_s2, %s3354_s12 }
  0x1e   : > { %423 = sbr.rel (%p3359_p10) target bundleno = 41 (0x29), region = 48 }
  0x23   : > { %vm424_vm0 = vcmask 31744   ;;  %v4348_v0 = vmov 0.0  }
  0x24   : > { %425 = vst.msk [vmem:[#allocation2 + $0x10] sm:$0xff] %vm424_vm0, %v4348_v0  ;;  %426 = vst.msk [vmem:[#allocation2 + $0x28] sm:$0xff] %vm424_vm0, %v4348_v0 }
  0x25   : > { %427 = vst.msk [vmem:[#allocation2 + $0x40] sm:$0xff] %vm424_vm0, %v4348_v0  ;;  %428 = vst.msk [vmem:[#allocation2 + $0x58] sm:$0xff] %vm424_vm0, %v4348_v0 }
  0x26   : > { %429 = vst.msk [vmem:[#allocation2 + $0x70] sm:$0xff] %vm424_vm0, %v4348_v0  ;;  %430 = vst.msk [vmem:[#allocation2 + $0x88] sm:$0xff] %vm424_vm0, %v4348_v0 }
  0x27   : > { %431 = vst.msk [vmem:[#allocation2 + $0xa0] sm:$0xff] %vm424_vm0, %v4348_v0  ;;  %432 = vst.msk [vmem:[#allocation2 + $0xb8] sm:$0xff] %vm424_vm0, %v4348_v0 }
  0x28   : > { %433 = vst.msk [vmem:[#allocation2 + $0xd0] sm:$0xff] %vm424_vm0, %v4348_v0  ;;  %434 = vst.msk [vmem:[#allocation2 + $0xe8] sm:$0xff] %vm424_vm0, %v4348_v0 }
  0x29 PF: > { %v4445_v1 = vld [vmem:[%s4424_s14] sm:$0xff]  ;;  %vm452_vm1 = vcmask 31744   ;;  %v4448_v2 = vld [vmem:[%s4424_s14 + $0x8] sm:$0xff]  ;;  %v4451_v3 = vld [vmem:[%s4424_s14 + $0x10] sm:$0xff]  ;;  %p3360_p11 = scmp.le.s32.totalorder %s4330_s21, 0 }
  0x2a   : > { %453 = vst.msk [vmem:[#allocation2 + $0x18] sm:$0xff] %vm452_vm1, %v4445_v1  ;;  %454 = vst.msk [vmem:[#allocation2 + $0x20] sm:$0xff] %vm452_vm1, %v4448_v2  ;;  %v4460_v4 = vld [vmem:[%s4424_s14 + $0x18] sm:$0xff]  ;;  %v4463_v5 = vld [vmem:[%s4424_s14 + $0x20] sm:$0xff] }
  0x2b   : > { %455 = vst.msk [vmem:[#allocation2 + $0x30] sm:$0xff] %vm452_vm1, %v4451_v3  ;;  %5690 = vst [vmem:[#allocation3_spill] sm:$0xff] %v4463_v5  ;;  %v4466_v6 = vld [vmem:[%s4424_s14 + $0x28] sm:$0xff]  ;;  %v4475_v7 = vld [vmem:[%s4424_s14 + $0x30] sm:$0xff] }
  0x2c   : > { %5691 = vst [vmem:[#allocation4_spill] sm:$0xff] %v4466_v6  ;;  %456 = vst.msk [vmem:[#allocation2 + $0x38] sm:$0xff] %vm452_vm1, %v4460_v4  ;;  %v4478_v8 = vld [vmem:[%s4424_s14 + $0x38] sm:$0xff]  ;;  %v4481_v9 = vld [vmem:[%s4424_s14 + $0x40] sm:$0xff] }
  0x2d   : > { %457 = vst.msk [vmem:[#allocation2 + $0x48] sm:$0xff] %vm452_vm1, %v4463_v5  ;;  %458 = vst.msk [vmem:[#allocation2 + $0x50] sm:$0xff] %vm452_vm1, %v4466_v6  ;;  %v4490_v10 = vld [vmem:[%s4424_s14 + $0x48] sm:$0xff]  ;;  %v4493_v11 = vld [vmem:[%s4424_s14 + $0x50] sm:$0xff] }
  0x2e   : > { %5692 = vst [vmem:[#allocation5_spill] sm:$0xff] %v4475_v7  ;;  %5693 = vst [vmem:[#allocation6_spill] sm:$0xff] %v4478_v8  ;;  %v4496_v12 = vld [vmem:[%s4424_s14 + $0x58] sm:$0xff]  ;;  %v4505_v13 = vld [vmem:[%s4424_s14 + $0x60] sm:$0xff] }
  0x2f   : > { %5694 = vst [vmem:[#allocation7_spill] sm:$0xff] %v4481_v9  ;;  %459 = vst.msk [vmem:[#allocation2 + $0x60] sm:$0xff] %vm452_vm1, %v4475_v7  ;;  %v4508_v14 = vld [vmem:[%s4424_s14 + $0x68] sm:$0xff]  ;;  %v4511_v15 = vld [vmem:[%s4424_s14 + $0x70] sm:$0xff] }
  0x30   : > { %460 = vst.msk [vmem:[#allocation2 + $0x68] sm:$0xff] %vm452_vm1, %v4478_v8  ;;  %461 = vst.msk [vmem:[#allocation2 + $0x78] sm:$0xff] %vm452_vm1, %v4481_v9  ;;  %v4520_v16 = vld [vmem:[%s4424_s14 + $0x78] sm:$0xff] }
  0x31   : > { %5695 = vst [vmem:[#allocation8_spill] sm:$0xff] %v4490_v10  ;;  %5696 = vst [vmem:[#allocation9_spill] sm:$0xff] %v4493_v11 }
  0x32   : > { %5697 = vst [vmem:[#allocation10_spill] sm:$0xff] %v4496_v12  ;;  %462 = vst.msk [vmem:[#allocation2 + $0x80] sm:$0xff] %vm452_vm1, %v4490_v10 }
  0x33   : > { %463 = vst.msk [vmem:[#allocation2 + $0x90] sm:$0xff] %vm452_vm1, %v4493_v11  ;;  %464 = vst.msk [vmem:[#allocation2 + $0x98] sm:$0xff] %vm452_vm1, %v4496_v12  ;;  %472 = sbr.rel (%p3360_p11) target bundleno = 58 (0x3a), region = 52 }
  0x34   : > { %5698 = vst [vmem:[#allocation11_spill] sm:$0xff] %v4505_v13  ;;  %5699 = vst [vmem:[#allocation12_spill] sm:$0xff] %v4508_v14 }
  0x35   : > { %5700 = vst [vmem:[#allocation13_spill] sm:$0xff] %v4511_v15  ;;  %465 = vst.msk [vmem:[#allocation2 + $0xa8] sm:$0xff] %vm452_vm1, %v4505_v13 }
  0x36   : > { %466 = vst.msk [vmem:[#allocation2 + $0xb0] sm:$0xff] %vm452_vm1, %v4508_v14  ;;  %467 = vst.msk [vmem:[#allocation2 + $0xc0] sm:$0xff] %vm452_vm1, %v4511_v15 }
  0x37   : > { %5701 = vst [vmem:[#allocation14_spill] sm:$0xff] %v4520_v16  ;;  %468 = vst.msk [vmem:[#allocation2 + $0xc8] sm:$0xff] %vm452_vm1, %v4520_v16 }
  0x38   : > { %v473_v17 = vld [vmem:[%s4434_s9] sm:$0xff]  ;;  %v474_v18 = vld [vmem:[%s4434_s9 + $0x8] sm:$0xff] }
  0x39   : > { %475 = vst.msk [vmem:[#allocation2] sm:$0xff] %vm452_vm1, %v473_v17  ;;  %476 = vst.msk [vmem:[#allocation2 + $0x8] sm:$0xff] %vm452_vm1, %v474_v18 }
  0x3a PF: > { %479 = sbr.rel (%p3359_p10) target bundleno = 65 (0x41), region = 56 }
  0x3f   : > { %v4349_v19 = vmov 0.0  }
  0x40   : > { %480 = vst.msk [vmem:[#allocation2] sm:$0xff] %vm452_vm1, %v4349_v19  ;;  %481 = vst.msk [vmem:[#allocation2 + $0x8] sm:$0xff] %vm452_vm1, %v4349_v19 }
  0x41 PF: > { %p3362_p12 = scmp.ge.s32.totalorder %s4330_s21, 1 }
  0x43   : > { %485 = sbr.rel (%p3362_p12) target bundleno = 74 (0x4a), region = 60 }
  0x48   : > { %v486_v20 = vld [vmem:[%s4439_s11] sm:$0xff]  ;;  %v487_v21 = vld [vmem:[%s4439_s11 + $0x8] sm:$0xff] }
  0x49   : > { %489 = vst.msk [vmem:[#allocation2 + $0xd8] sm:$0xff] %vm452_vm1, %v486_v20  ;;  %490 = vst.msk [vmem:[#allocation2 + $0xe0] sm:$0xff] %vm452_vm1, %v487_v21 }
  0x4a PF: > { %p3363_p13 = scmp.ne.s32.totalorder %s4330_s21, 1 }
  0x4c   : > { %494 = sbr.rel (%p3363_p13) target bundleno = 83 (0x53), region = 64 }
  0x51   : > { %v4350_v22 = vmov 0.0  }
  0x52   : > { %496 = vst.msk [vmem:[#allocation2 + $0xd8] sm:$0xff] %vm452_vm1, %v4350_v22  ;;  %497 = vst.msk [vmem:[#allocation2 + $0xe0] sm:$0xff] %vm452_vm1, %v4350_v22 }
  0x53 PF: > { %v523_v23 = vld [vmem:[%s5672_s3] sm:$0xf]  ;;  %vm596_vm2 = vcmask 1043456   ;;  %v3390_v24 = vld [vmem:[%s5673_s4 + $0xc] sm:$0xf]  ;;  %v4547_v25 = vld [vmem:[#allocation2 + $0x18] sm:$0xff] }
  0x54   : > { %3883 = vmatprep.subr.msk.mxu0 %vm596_vm2, %v523_v23  ;;  %3921 = vmatprep.subr.msk.mxu1 %vm596_vm2, %v3390_v24  ;;  %v4551_v26 = vld [vmem:[#allocation2 + $0x20] sm:$0xff]  ;;  %v3441_v28 = vld [vmem:[%s5673_s4 + $0x18] sm:$0xf]  ;;  %v4565_v29 = vld [vmem:[#allocation2 + $0x28] sm:$0xff]  ;;  %s4351_s10 = smov 126   ;;  %vm847_vm3 = vcmask 15360  }
  0x55   : > { %3884 = vmatpush3.msk.msra.mxu0 %vm596_vm2, %v523_v23  ;;  %3885 = vmatprep.mubr.msk.f32.mxu0 %vm452_vm1, %v4547_v25  ;;  %v888_v27 = vld [vmem:[%s5673_s4] sm:$0xf]  ;;  %v4573_v30 = vld [vmem:[#allocation2 + $0x30] sm:$0xff]  ;;  %v4578_v31 = vld [vmem:[#allocation2 + $0x38] sm:$0xff]  ;;  %s4352_s21 = smov 2   ;;  %vm3165_vm6 = vcmask 31760  }
  0x56   : > { %3922 = vmatpush3.msk.msra.mxu1 %vm596_vm2, %v3390_v24  ;;  %3923 = vmatprep.mubr.msk.f32.mxu1 %vm452_vm1, %v4547_v25  ;;  %v4591_v32 = vld [vmem:[#allocation2 + $0x40] sm:$0xff]  ;;  %v4593_v33 = vld [vmem:[#allocation2 + $0x48] sm:$0xff]  ;;  %v4598_v34 = vld [vmem:[%s5673_s4 + $0x10] sm:$0xf] }
  0x57   : > { %3886 = vmatmul.mubr.msk.f32.vlgmr.msra.gmra.mxu0 %vm452_vm1, %v4551_v26  ;;  %3924 = vmatmul.mubr.msk.f32.vlgmr.msra.gmra.mxu1 %vm452_vm1, %v4551_v26  ;;  %v4603_v35 = vld [vmem:[%s5673_s4 + $0x4] sm:$0xf]  ;;  %v4617_v36 = vld [vmem:[#allocation2 + $0x50] sm:$0xff]  ;;  %v4619_v37 = vld [vmem:[#allocation2 + $0x58] sm:$0xff] }
  0x58   : > { %3959 = vmatprep.subr.msk.mxu0 %vm596_vm2, %v888_v27  ;;  %3997 = vmatprep.subr.msk.mxu1 %vm596_vm2, %v3441_v28  ;;  %v4629_v38 = vld [vmem:[#allocation2 + $0x60] sm:$0xff]  ;;  %v4631_v39 = vld [vmem:[#allocation2 + $0x68] sm:$0xff]  ;;  %v4641_v40 = vld [vmem:[#allocation2 + $0x70] sm:$0xff] }
  0x59   : > { %3960 = vmatpush3.msk.msra.mxu0 %vm596_vm2, %v888_v27  ;;  %3888 = vmatprep.mubr.msk.f32.mxu0 %vm452_vm1, %v4565_v29  ;;  %v4643_v41 = vld [vmem:[#allocation2 + $0x78] sm:$0xff]  ;;  %v4653_v42 = vld [vmem:[#allocation2 + $0x80] sm:$0xff]  ;;  %v4655_v43 = vld [vmem:[#allocation2 + $0x88] sm:$0xff] }
  0x5a   : > { %3926 = vmatprep.mubr.msk.f32.mxu1 %vm452_vm1, %v4565_v29  ;;  %3998 = vmatpush3.msk.msra.mxu1 %vm596_vm2, %v3441_v28  ;;  %v4665_v44 = vld [vmem:[#allocation2 + $0x90] sm:$0xff]  ;;  %v4667_v45 = vld [vmem:[#allocation2 + $0x98] sm:$0xff]  ;;  %v4677_v46 = vld [vmem:[#allocation2 + $0xa0] sm:$0xff] }
  0x5b   : > { %3889 = vmatmul.mubr.msk.f32.gmra.mxu0 %vm452_vm1, %v4573_v30  ;;  %3927 = vmatmul.mubr.msk.f32.gmra.mxu1 %vm452_vm1, %v4573_v30  ;;  %v4679_v47 = vld [vmem:[#allocation2 + $0xa8] sm:$0xff]  ;;  %v4689_v48 = vld [vmem:[#allocation2 + $0xb0] sm:$0xff]  ;;  %v4691_v49 = vld [vmem:[#allocation2 + $0xb8] sm:$0xff] }
  0x5c   : > { %3891 = vmatprep.mubr.msk.f32.mxu0 %vm452_vm1, %v4578_v31  ;;  %3929 = vmatprep.mubr.msk.f32.mxu1 %vm452_vm1, %v4578_v31  ;;  %v4701_v50 = vld [vmem:[#allocation2 + $0xc0] sm:$0xff]  ;;  %v4703_v51 = vld [vmem:[#allocation2 + $0xc8] sm:$0xff]  ;;  %v4713_v52 = vld [vmem:[#allocation2 + $0xd0] sm:$0xff] }
  0x5d   : > { %4035 = vmatprep.subr.msk.mxu0 %vm596_vm2, %v4598_v34  ;;  %4073 = vmatprep.subr.msk.mxu1 %vm596_vm2, %v4603_v35  ;;  %v4715_v53 = vld [vmem:[#allocation2] sm:$0xff]  ;;  %v4725_v54 = vld [vmem:[#allocation2 + $0x8] sm:$0xff]  ;;  %v4727_v55 = vld [vmem:[#allocation2 + $0x10] sm:$0xff] }
  0x5e   : > { %v3519_v56 = vld [vmem:[%s5673_s4 + $0x1c] sm:$0xf]  ;;  %v3546_v57 = vld [vmem:[%s5673_s4 + $0x14] sm:$0xf]  ;;  %v4823_v59 = vld [vmem:[#allocation2 + $0xe0] sm:$0xff] }
  0x5f   : > { %3892 = vmatmul.mubr.msk.f32.gmra.mxu0 %vm452_vm1, %v4591_v32  ;;  %3930 = vmatmul.mubr.msk.f32.gmra.mxu1 %vm452_vm1, %v4591_v32  ;;  %v4821_v58 = vld [vmem:[#allocation2 + $0xd8] sm:$0xff]  ;;  %v4833_v60 = vld [vmem:[#allocation2 + $0xe8] sm:$0xff]  ;;  %v3597_v62 = vld [vmem:[%s5673_s4 + $0x20] sm:$0xf] }
  0x60   : > { %3894 = vmatprep.mubr.msk.f32.mxu0 %vm452_vm1, %v4593_v33  ;;  %3932 = vmatprep.mubr.msk.f32.mxu1 %vm452_vm1, %v4593_v33  ;;  %v3545_v61 = vld [vmem:[%s5673_s4 + $0x8] sm:$0xf]  ;;  %v4978_v63 = vld [vmem:[%s5674_s5] ss:$0 sm:$0xff] }
  0x61   : > { %3034 = vrot.lane.b32.xlu0 %v4978_v63, %s4351_s10 }
  0x63   : > { %3895 = vmatmul.mubr.msk.f32.gmra.mxu0 %vm452_vm1, %v4617_v36  ;;  %3933 = vmatmul.mubr.msk.f32.gmra.mxu1 %vm452_vm1, %v4617_v36 }
  0x64   : > { %3897 = vmatprep.mubr.msk.f32.mxu0 %vm452_vm1, %v4619_v37  ;;  %3935 = vmatprep.mubr.msk.f32.mxu1 %vm452_vm1, %v4619_v37 }
  0x67   : > { %3898 = vmatmul.mubr.msk.f32.gmra.mxu0 %vm452_vm1, %v4629_v38  ;;  %3936 = vmatmul.mubr.msk.f32.gmra.mxu1 %vm452_vm1, %v4629_v38 }
  0x68   : > { %3900 = vmatprep.mubr.msk.f32.mxu0 %vm452_vm1, %v4631_v39  ;;  %3938 = vmatprep.mubr.msk.f32.mxu1 %vm452_vm1, %v4631_v39 }
  0x6b   : > { %3901 = vmatmul.mubr.msk.f32.gmra.mxu0 %vm452_vm1, %v4641_v40  ;;  %3939 = vmatmul.mubr.msk.f32.gmra.mxu1 %vm452_vm1, %v4641_v40 }
  0x6c   : > { %3903 = vmatprep.mubr.msk.f32.mxu0 %vm452_vm1, %v4643_v41  ;;  %3941 = vmatprep.mubr.msk.f32.mxu1 %vm452_vm1, %v4643_v41 }
  0x6f   : > { %3904 = vmatmul.mubr.msk.f32.gmra.mxu0 %vm452_vm1, %v4653_v42  ;;  %3942 = vmatmul.mubr.msk.f32.gmra.mxu1 %vm452_vm1, %v4653_v42 }
  0x70   : > { %3906 = vmatprep.mubr.msk.f32.mxu0 %vm452_vm1, %v4655_v43  ;;  %3944 = vmatprep.mubr.msk.f32.mxu1 %vm452_vm1, %v4655_v43 }
  0x73   : > { %3907 = vmatmul.mubr.msk.f32.gmra.mxu0 %vm452_vm1, %v4665_v44  ;;  %3945 = vmatmul.mubr.msk.f32.gmra.mxu1 %vm452_vm1, %v4665_v44 }
  0x74   : > { %3909 = vmatprep.mubr.msk.f32.mxu0 %vm452_vm1, %v4667_v45  ;;  %3947 = vmatprep.mubr.msk.f32.mxu1 %vm452_vm1, %v4667_v45 }
  0x77   : > { %3910 = vmatmul.mubr.msk.f32.gmra.mxu0 %vm452_vm1, %v4677_v46  ;;  %3948 = vmatmul.mubr.msk.f32.gmra.mxu1 %vm452_vm1, %v4677_v46 }
  0x78   : > { %3912 = vmatprep.mubr.msk.f32.mxu0 %vm452_vm1, %v4679_v47  ;;  %3950 = vmatprep.mubr.msk.f32.mxu1 %vm452_vm1, %v4679_v47 }
  0x7b   : > { %3913 = vmatmul.mubr.msk.f32.gmra.mxu0 %vm452_vm1, %v4689_v48  ;;  %3951 = vmatmul.mubr.msk.f32.gmra.mxu1 %vm452_vm1, %v4689_v48 }
  0x7c   : > { %3915 = vmatprep.mubr.msk.f32.mxu0 %vm452_vm1, %v4691_v49  ;;  %3953 = vmatprep.mubr.msk.f32.mxu1 %vm452_vm1, %v4691_v49 }
  0x7f   : > { %3916 = vmatmul.mubr.msk.f32.gmra.mxu0 %vm452_vm1, %v4701_v50  ;;  %3954 = vmatmul.mubr.msk.f32.gmra.mxu1 %vm452_vm1, %v4701_v50 }
  0x80   : > { %3918 = vmatprep.mubr.msk.f32.mxu0 %vm452_vm1, %v4703_v51  ;;  %3956 = vmatprep.mubr.msk.f32.mxu1 %vm452_vm1, %v4703_v51 }
  0x83   : > { %3919 = vmatmul.mubr.msk.f32.gmra.mxu0 %vm452_vm1, %v4713_v52  ;;  %3957 = vmatmul.mubr.msk.f32.gmra.mxu1 %vm452_vm1, %v4713_v52 }
  0x84   : > { %3961 = vmatprep.mubr.msk.f32.mxu0 %vm452_vm1, %v4715_v53  ;;  %3999 = vmatprep.mubr.msk.f32.mxu1 %vm452_vm1, %v4573_v30 }
  0x87   : > { %3962 = vmatmul.mubr.msk.f32.vlgmr.msra.gmra.mxu0 %vm452_vm1, %v4725_v54  ;;  %4000 = vmatmul.mubr.msk.f32.vlgmr.msra.gmra.mxu1 %vm452_vm1, %v4578_v31 }
  0x88   : > { %4036 = vmatpush3.msk.msra.mxu0 %vm596_vm2, %v4598_v34  ;;  %3964 = vmatprep.mubr.msk.f32.mxu0 %vm452_vm1, %v4727_v55 }
  0x89   : > { %4002 = vmatprep.mubr.msk.f32.mxu1 %vm452_vm1, %v4591_v32  ;;  %4074 = vmatpush3.msk.msra.mxu1 %vm596_vm2, %v4603_v35 }
  0x8a   : > { %4111 = vmatprep.subr.msk.mxu0 %vm596_vm2, %v3519_v56  ;;  %4149 = vmatprep.subr.msk.mxu1 %vm596_vm2, %v3546_v57 }
  0x8b   : > { %3965 = vmatmul.mubr.msk.f32.gmra.mxu0 %vm452_vm1, %v4547_v25  ;;  %4003 = vmatmul.mubr.msk.f32.gmra.mxu1 %vm452_vm1, %v4593_v33 }
  0x8c   : > { %3967 = vmatprep.mubr.msk.f32.mxu0 %vm452_vm1, %v4551_v26  ;;  %4005 = vmatprep.mubr.msk.f32.mxu1 %vm452_vm1, %v4617_v36 }
  0x8f   : > { %3968 = vmatmul.mubr.msk.f32.gmra.mxu0 %vm452_vm1, %v4565_v29  ;;  %4006 = vmatmul.mubr.msk.f32.gmra.mxu1 %vm452_vm1, %v4619_v37 }
  0x90   : > { %3970 = vmatprep.mubr.msk.f32.mxu0 %vm452_vm1, %v4573_v30  ;;  %4008 = vmatprep.mubr.msk.f32.mxu1 %vm452_vm1, %v4629_v38 }
  0x93   : > { %3971 = vmatmul.mubr.msk.f32.gmra.mxu0 %vm452_vm1, %v4578_v31  ;;  %4009 = vmatmul.mubr.msk.f32.gmra.mxu1 %vm452_vm1, %v4631_v39 }
  0x94   : > { %3973 = vmatprep.mubr.msk.f32.mxu0 %vm452_vm1, %v4591_v32  ;;  %4011 = vmatprep.mubr.msk.f32.mxu1 %vm452_vm1, %v4641_v40 }
  0x97   : > { %3974 = vmatmul.mubr.msk.f32.gmra.mxu0 %vm452_vm1, %v4593_v33  ;;  %4012 = vmatmul.mubr.msk.f32.gmra.mxu1 %vm452_vm1, %v4643_v41 }
  0x98   : > { %3976 = vmatprep.mubr.msk.f32.mxu0 %vm452_vm1, %v4617_v36  ;;  %4014 = vmatprep.mubr.msk.f32.mxu1 %vm452_vm1, %v4653_v42 }
  0x9b   : > { %3977 = vmatmul.mubr.msk.f32.gmra.mxu0 %vm452_vm1, %v4619_v37  ;;  %4015 = vmatmul.mubr.msk.f32.gmra.mxu1 %vm452_vm1, %v4655_v43 }
  0x9c   : > { %3979 = vmatprep.mubr.msk.f32.mxu0 %vm452_vm1, %v4629_v38  ;;  %4017 = vmatprep.mubr.msk.f32.mxu1 %vm452_vm1, %v4665_v44 }
  0x9f   : > { %3980 = vmatmul.mubr.msk.f32.gmra.mxu0 %vm452_vm1, %v4631_v39  ;;  %4018 = vmatmul.mubr.msk.f32.gmra.mxu1 %vm452_vm1, %v4667_v45 }
  0xa0   : > { %3982 = vmatprep.mubr.msk.f32.mxu0 %vm452_vm1, %v4641_v40  ;;  %4020 = vmatprep.mubr.msk.f32.mxu1 %vm452_vm1, %v4677_v46 }
  0xa3   : > { %3983 = vmatmul.mubr.msk.f32.gmra.mxu0 %vm452_vm1, %v4643_v41  ;;  %4021 = vmatmul.mubr.msk.f32.gmra.mxu1 %vm452_vm1, %v4679_v47 }
  0xa4   : > { %3985 = vmatprep.mubr.msk.f32.mxu0 %vm452_vm1, %v4653_v42  ;;  %4023 = vmatprep.mubr.msk.f32.mxu1 %vm452_vm1, %v4689_v48 }
  0xa7   : > { %3986 = vmatmul.mubr.msk.f32.gmra.mxu0 %vm452_vm1, %v4655_v43  ;;  %4024 = vmatmul.mubr.msk.f32.gmra.mxu1 %vm452_vm1, %v4691_v49 }
  0xa8   : > { %3988 = vmatprep.mubr.msk.f32.mxu0 %vm452_vm1, %v4665_v44  ;;  %4026 = vmatprep.mubr.msk.f32.mxu1 %vm452_vm1, %v4701_v50 }
  0xab   : > { %3989 = vmatmul.mubr.msk.f32.gmra.mxu0 %vm452_vm1, %v4667_v45  ;;  %4027 = vmatmul.mubr.msk.f32.gmra.mxu1 %vm452_vm1, %v4703_v51 }
  0xac   : > { %3991 = vmatprep.mubr.msk.f32.mxu0 %vm452_vm1, %v4677_v46  ;;  %4029 = vmatprep.mubr.msk.f32.mxu1 %vm452_vm1, %v4713_v52 }
  0xaf   : > { %3992 = vmatmul.mubr.msk.f32.gmra.mxu0 %vm452_vm1, %v4679_v47  ;;  %4030 = vmatmul.mubr.msk.f32.gmra.mxu1 %vm452_vm1, %v4821_v58 }
  0xb0   : > { %3994 = vmatprep.mubr.msk.f32.mxu0 %vm452_vm1, %v4689_v48  ;;  %4032 = vmatprep.mubr.msk.f32.mxu1 %vm452_vm1, %v4823_v59 }
  0xb3   : > { %3995 = vmatmul.mubr.msk.f32.gmra.mxu0 %vm452_vm1, %v4691_v49  ;;  %4033 = vmatmul.mubr.msk.f32.gmra.mxu1 %vm452_vm1, %v4833_v60 }
  0xb4   : > { %4037 = vmatprep.mubr.msk.f32.mxu0 %vm452_vm1, %v4547_v25  ;;  %4075 = vmatprep.mubr.msk.f32.mxu1 %vm452_vm1, %v4715_v53 }
  0xb7   : > { %4038 = vmatmul.mubr.msk.f32.vlgmr.msra.gmra.mxu0 %vm452_vm1, %v4551_v26  ;;  %4076 = vmatmul.mubr.msk.f32.vlgmr.msra.gmra.mxu1 %vm452_vm1, %v4725_v54 }
  0xb8   : > { %4112 = vmatpush3.msk.msra.mxu0 %vm596_vm2, %v3519_v56  ;;  %4040 = vmatprep.mubr.msk.f32.mxu0 %vm452_vm1, %v4565_v29 }
  0xb9   : > { %4078 = vmatprep.mubr.msk.f32.mxu1 %vm452_vm1, %v4727_v55  ;;  %4150 = vmatpush3.msk.msra.mxu1 %vm596_vm2, %v3546_v57 }
  0xba   : > { %4187 = vmatprep.subr.msk.mxu0 %vm596_vm2, %v3545_v61  ;;  %4225 = vmatprep.subr.msk.mxu1 %vm596_vm2, %v3597_v62 }
  0xbb   : > { %4041 = vmatmul.mubr.msk.f32.gmra.mxu0 %vm452_vm1, %v4573_v30  ;;  %4079 = vmatmul.mubr.msk.f32.gmra.mxu1 %vm452_vm1, %v4547_v25 }
  0xbc   : > { %4043 = vmatprep.mubr.msk.f32.mxu0 %vm452_vm1, %v4578_v31  ;;  %4081 = vmatprep.mubr.msk.f32.mxu1 %vm452_vm1, %v4551_v26 }
  0xbf   : > { %4044 = vmatmul.mubr.msk.f32.gmra.mxu0 %vm452_vm1, %v4591_v32  ;;  %4082 = vmatmul.mubr.msk.f32.gmra.mxu1 %vm452_vm1, %v4565_v29 }
  0xc0   : > { %4046 = vmatprep.mubr.msk.f32.mxu0 %vm452_vm1, %v4593_v33  ;;  %4084 = vmatprep.mubr.msk.f32.mxu1 %vm452_vm1, %v4573_v30 }
  0xc3   : > { %4047 = vmatmul.mubr.msk.f32.gmra.mxu0 %vm452_vm1, %v4617_v36  ;;  %4085 = vmatmul.mubr.msk.f32.gmra.mxu1 %vm452_vm1, %v4578_v31 }
  0xc4   : > { %4049 = vmatprep.mubr.msk.f32.mxu0 %vm452_vm1, %v4619_v37  ;;  %4087 = vmatprep.mubr.msk.f32.mxu1 %vm452_vm1, %v4591_v32 }
  0xc7   : > { %4050 = vmatmul.mubr.msk.f32.gmra.mxu0 %vm452_vm1, %v4629_v38  ;;  %4088 = vmatmul.mubr.msk.f32.gmra.mxu1 %vm452_vm1, %v4593_v33 }
  0xc8   : > { %4052 = vmatprep.mubr.msk.f32.mxu0 %vm452_vm1, %v4631_v39  ;;  %4090 = vmatprep.mubr.msk.f32.mxu1 %vm452_vm1, %v4617_v36 }
  0xcb   : > { %4053 = vmatmul.mubr.msk.f32.gmra.mxu0 %vm452_vm1, %v4641_v40  ;;  %4091 = vmatmul.mubr.msk.f32.gmra.mxu1 %vm452_vm1, %v4619_v37 }
  0xcc   : > { %4055 = vmatprep.mubr.msk.f32.mxu0 %vm452_vm1, %v4643_v41  ;;  %4093 = vmatprep.mubr.msk.f32.mxu1 %vm452_vm1, %v4629_v38 }
  0xcf   : > { %4056 = vmatmul.mubr.msk.f32.gmra.mxu0 %vm452_vm1, %v4653_v42  ;;  %4094 = vmatmul.mubr.msk.f32.gmra.mxu1 %vm452_vm1, %v4631_v39 }
  0xd0   : > { %4058 = vmatprep.mubr.msk.f32.mxu0 %vm452_vm1, %v4655_v43  ;;  %4096 = vmatprep.mubr.msk.f32.mxu1 %vm452_vm1, %v4641_v40 }
  0xd3   : > { %4059 = vmatmul.mubr.msk.f32.gmra.mxu0 %vm452_vm1, %v4665_v44  ;;  %4097 = vmatmul.mubr.msk.f32.gmra.mxu1 %vm452_vm1, %v4643_v41 }
  0xd4   : > { %4061 = vmatprep.mubr.msk.f32.mxu0 %vm452_vm1, %v4667_v45  ;;  %4099 = vmatprep.mubr.msk.f32.mxu1 %vm452_vm1, %v4653_v42 }
  0xd7   : > { %4062 = vmatmul.mubr.msk.f32.gmra.mxu0 %vm452_vm1, %v4677_v46  ;;  %4100 = vmatmul.mubr.msk.f32.gmra.mxu1 %vm452_vm1, %v4655_v43 }
  0xd8   : > { %4064 = vmatprep.mubr.msk.f32.mxu0 %vm452_vm1, %v4679_v47  ;;  %4102 = vmatprep.mubr.msk.f32.mxu1 %vm452_vm1, %v4665_v44 }
  0xdb   : > { %4065 = vmatmul.mubr.msk.f32.gmra.mxu0 %vm452_vm1, %v4689_v48  ;;  %4103 = vmatmul.mubr.msk.f32.gmra.mxu1 %vm452_vm1, %v4667_v45 }
  0xdc   : > { %4067 = vmatprep.mubr.msk.f32.mxu0 %vm452_vm1, %v4691_v49  ;;  %4105 = vmatprep.mubr.msk.f32.mxu1 %vm452_vm1, %v4677_v46 }
  0xdf   : > { %4068 = vmatmul.mubr.msk.f32.gmra.mxu0 %vm452_vm1, %v4701_v50  ;;  %4106 = vmatmul.mubr.msk.f32.gmra.mxu1 %vm452_vm1, %v4679_v47 }
  0xe0   : > { %4070 = vmatprep.mubr.msk.f32.mxu0 %vm452_vm1, %v4703_v51  ;;  %4108 = vmatprep.mubr.msk.f32.mxu1 %vm452_vm1, %v4689_v48 }
  0xe3   : > { %4071 = vmatmul.mubr.msk.f32.gmra.mxu0 %vm452_vm1, %v4713_v52  ;;  %4109 = vmatmul.mubr.msk.f32.gmra.mxu1 %vm452_vm1, %v4691_v49 }
  0xe4   : > { %4113 = vmatprep.mubr.msk.f32.mxu0 %vm452_vm1, %v4573_v30  ;;  %4151 = vmatprep.mubr.msk.f32.mxu1 %vm452_vm1, %v4547_v25 }
  0xe7   : > { %4114 = vmatmul.mubr.msk.f32.vlgmr.msra.gmra.mxu0 %vm452_vm1, %v4578_v31  ;;  %4152 = vmatmul.mubr.msk.f32.vlgmr.msra.gmra.mxu1 %vm452_vm1, %v4551_v26 }
  0xe8   : > { %4188 = vmatpush3.msk.msra.mxu0 %vm596_vm2, %v3545_v61  ;;  %4116 = vmatprep.mubr.msk.f32.mxu0 %vm452_vm1, %v4591_v32 }
  0xe9   : > { %4226 = vmatpush3.msk.msra.mxu1 %vm596_vm2, %v3597_v62  ;;  %4154 = vmatprep.mubr.msk.f32.mxu1 %vm452_vm1, %v4565_v29 }
  0xeb   : > { %4117 = vmatmul.mubr.msk.f32.gmra.mxu0 %vm452_vm1, %v4593_v33  ;;  %4155 = vmatmul.mubr.msk.f32.gmra.mxu1 %vm452_vm1, %v4573_v30 }
  0xec   : > { %4119 = vmatprep.mubr.msk.f32.mxu0 %vm452_vm1, %v4617_v36  ;;  %4157 = vmatprep.mubr.msk.f32.mxu1 %vm452_vm1, %v4578_v31 }
  0xef   : > { %4120 = vmatmul.mubr.msk.f32.gmra.mxu0 %vm452_vm1, %v4619_v37  ;;  %4158 = vmatmul.mubr.msk.f32.gmra.mxu1 %vm452_vm1, %v4591_v32 }
  0xf0   : > { %4122 = vmatprep.mubr.msk.f32.mxu0 %vm452_vm1, %v4629_v38  ;;  %4160 = vmatprep.mubr.msk.f32.mxu1 %vm452_vm1, %v4593_v33 }
  0xf3   : > { %4123 = vmatmul.mubr.msk.f32.gmra.mxu0 %vm452_vm1, %v4631_v39  ;;  %4161 = vmatmul.mubr.msk.f32.gmra.mxu1 %vm452_vm1, %v4617_v36 }
  0xf4   : > { %4125 = vmatprep.mubr.msk.f32.mxu0 %vm452_vm1, %v4641_v40  ;;  %4163 = vmatprep.mubr.msk.f32.mxu1 %vm452_vm1, %v4619_v37 }
  0xf7   : > { %4126 = vmatmul.mubr.msk.f32.gmra.mxu0 %vm452_vm1, %v4643_v41  ;;  %4164 = vmatmul.mubr.msk.f32.gmra.mxu1 %vm452_vm1, %v4629_v38 }
  0xf8   : > { %4128 = vmatprep.mubr.msk.f32.mxu0 %vm452_vm1, %v4653_v42  ;;  %4166 = vmatprep.mubr.msk.f32.mxu1 %vm452_vm1, %v4631_v39 }
  0xfb   : > { %4129 = vmatmul.mubr.msk.f32.gmra.mxu0 %vm452_vm1, %v4655_v43  ;;  %4167 = vmatmul.mubr.msk.f32.gmra.mxu1 %vm452_vm1, %v4641_v40 }
  0xfc   : > { %4131 = vmatprep.mubr.msk.f32.mxu0 %vm452_vm1, %v4665_v44  ;;  %4169 = vmatprep.mubr.msk.f32.mxu1 %vm452_vm1, %v4643_v41 }
  0xff   : > { %4132 = vmatmul.mubr.msk.f32.gmra.mxu0 %vm452_vm1, %v4667_v45  ;;  %4170 = vmatmul.mubr.msk.f32.gmra.mxu1 %vm452_vm1, %v4653_v42 }
 0x100   : > { %4134 = vmatprep.mubr.msk.f32.mxu0 %vm452_vm1, %v4677_v46  ;;  %4172 = vmatprep.mubr.msk.f32.mxu1 %vm452_vm1, %v4655_v43 }
 0x103   : > { %4135 = vmatmul.mubr.msk.f32.gmra.mxu0 %vm452_vm1, %v4679_v47  ;;  %4173 = vmatmul.mubr.msk.f32.gmra.mxu1 %vm452_vm1, %v4665_v44 }
 0x104   : > { %4137 = vmatprep.mubr.msk.f32.mxu0 %vm452_vm1, %v4689_v48  ;;  %4175 = vmatprep.mubr.msk.f32.mxu1 %vm452_vm1, %v4667_v45 }
 0x107   : > { %4138 = vmatmul.mubr.msk.f32.gmra.mxu0 %vm452_vm1, %v4691_v49  ;;  %4176 = vmatmul.mubr.msk.f32.gmra.mxu1 %vm452_vm1, %v4677_v46 }
 0x108   : > { %4140 = vmatprep.mubr.msk.f32.mxu0 %vm452_vm1, %v4701_v50  ;;  %4178 = vmatprep.mubr.msk.f32.mxu1 %vm452_vm1, %v4679_v47 }
 0x10b   : > { %4141 = vmatmul.mubr.msk.f32.gmra.mxu0 %vm452_vm1, %v4703_v51  ;;  %4179 = vmatmul.mubr.msk.f32.gmra.mxu1 %vm452_vm1, %v4689_v48 }
 0x10c   : > { %4143 = vmatprep.mubr.msk.f32.mxu0 %vm452_vm1, %v4713_v52  ;;  %4181 = vmatprep.mubr.msk.f32.mxu1 %vm452_vm1, %v4691_v49 }
 0x10f   : > { %4144 = vmatmul.mubr.msk.f32.gmra.mxu0 %vm452_vm1, %v4821_v58  ;;  %4182 = vmatmul.mubr.msk.f32.gmra.mxu1 %vm452_vm1, %v4701_v50 }
 0x110   : > { %4146 = vmatprep.mubr.msk.f32.mxu0 %vm452_vm1, %v4823_v59  ;;  %4184 = vmatprep.mubr.msk.f32.mxu1 %vm452_vm1, %v4703_v51 }
 0x113   : > { %4147 = vmatmul.mubr.msk.f32.gmra.mxu0 %vm452_vm1, %v4833_v60  ;;  %4185 = vmatmul.mubr.msk.f32.gmra.mxu1 %vm452_vm1, %v4713_v52 }
 0x114   : > { %4189 = vmatprep.mubr.msk.f32.mxu0 %vm452_vm1, %v4715_v53  ;;  %4227 = vmatprep.mubr.msk.f32.mxu1 %vm452_vm1, %v4573_v30 }
 0x117   : > { %v3887_v0 = vpop.f32.mrf.mxu0  ;;  %v5053_v17 = vpop.f32.mrf.mxu1  ;;  %4190 = vmatmul.mubr.msk.f32.vlgmr.msra.gmra.mxu0 %vm452_vm1, %v4725_v54  ;;  %4228 = vmatmul.mubr.msk.f32.vlgmr.msra.gmra.mxu1 %vm452_vm1, %v4578_v31 }
 0x118   : > { %v784_v18 = vadd.f32 %v3887_v0, %v4978_v63  ;;  %4192 = vmatprep.mubr.msk.f32.mxu0 %vm452_vm1, %v4727_v55  ;;  %4230 = vmatprep.mubr.msk.f32.mxu1 %vm452_vm1, %v4591_v32 }
 0x119   : > { %v666_v19 = vpop.f32.mrf.mxu0  ;;  %v5064_v20 = vpop.f32.mrf.mxu1 }
 0x11a   : > { %v800_v21 = vmul.f32 0.1, %v784_v18  ;;  %v783_v22 = vadd.f32 %v4978_v63, %v666_v19 }
 0x11b   : > { %v3890_v23 = vpop.f32.mrf.mxu0  ;;  %v5067_v24 = vpop.f32.mrf.mxu1  ;;  %4193 = vmatmul.mubr.msk.f32.gmra.mxu0 %vm452_vm1, %v4547_v25  ;;  %4231 = vmatmul.mubr.msk.f32.gmra.mxu1 %vm452_vm1, %v4593_v33 }
 0x11c   : > { %v816_v27 = vmax.f32 %v784_v18, %v800_v21  ;;  %v799_v28 = vmul.f32 0.1, %v783_v22  ;;  %v785_v34 = vadd.f32 %v3890_v23, %v4978_v63  ;;  %4195 = vmatprep.mubr.msk.f32.mxu0 %vm452_vm1, %v4551_v26  ;;  %4233 = vmatprep.mubr.msk.f32.mxu1 %vm452_vm1, %v4617_v36 }
 0x11d   : > { %v676_v35 = vpop.f32.mrf.mxu0  ;;  %v5078_v53 = vpop.f32.mrf.mxu1 }
 0x11e   : > { %v832_v25 = vadd.f32 %v816_v27, %v4448_v2  ;;  %v815_v54 = vmax.f32 %v783_v22, %v799_v28  ;;  %v801_v55 = vmul.f32 0.1, %v785_v34 }
 0x11f   : > { %v3893_v56 = vpop.f32.mrf.mxu0  ;;  %v5081_v57 = vpop.f32.mrf.mxu1  ;;  %4196 = vmatmul.mubr.msk.f32.gmra.mxu0 %vm452_vm1, %v4565_v29  ;;  %4234 = vmatmul.mubr.msk.f32.gmra.mxu1 %vm452_vm1, %v4619_v37 }
 0x120   : > { %849 = vst.msk [vmem:[%s4429_s17 + $0x8] sm:$0xff] %vm847_vm3, %v832_v25  ;;  %v831_v26 = vadd.f32 %v815_v54, %v4445_v1  ;;  %v817_v61 = vmax.f32 %v785_v34, %v801_v55  ;;  %4198 = vmatprep.mubr.msk.f32.mxu0 %vm452_vm1, %v4573_v30  ;;  %4236 = vmatprep.mubr.msk.f32.mxu1 %vm452_vm1, %v4629_v38 }
 0x121   : > { %v685_v62 = vpop.f32.mrf.mxu0  ;;  %v5094_v0 = vpop.f32.mrf.mxu1 }
 0x122   : > { %848 = vst.msk [vmem:[%s4429_s17] sm:$0xff] %vm847_vm3, %v831_v26  ;;  %v833_v29 = vadd.f32 %v817_v61, %v4451_v3  ;;  %v786_v18 = vadd.f32 %v4978_v63, %v685_v62 }
 0x123   : > { %v3896_v19 = vpop.f32.mrf.mxu0  ;;  %v5100_v21 = vpop.f32.mrf.mxu1  ;;  %4199 = vmatmul.mubr.msk.f32.gmra.mxu0 %vm452_vm1, %v4578_v31  ;;  %4237 = vmatmul.mubr.msk.f32.gmra.mxu1 %vm452_vm1, %v4631_v39 }
 0x124   : > { %850 = vst.msk [vmem:[%s4429_s17 + $0x10] sm:$0xff] %vm847_vm3, %v833_v29  ;;  %v802_v30 = vmul.f32 0.1, %v786_v18  ;;  %v788_v22 = vadd.f32 %v3896_v19, %v4978_v63  ;;  %4201 = vmatprep.mubr.msk.f32.mxu0 %vm452_vm1, %v4591_v32  ;;  %4239 = vmatprep.mubr.msk.f32.mxu1 %vm452_vm1, %v4641_v40 }
 0x125   : > { %v694_v23 = vpop.f32.mrf.mxu0  ;;  %v5113_v27 = vpop.f32.mrf.mxu1 }
 0x126   : > { %v818_v28 = vmax.f32 %v786_v18, %v802_v30  ;;  %v804_v31 = vmul.f32 0.1, %v788_v22  ;;  %v787_v34 = vadd.f32 %v4978_v63, %v694_v23 }
 0x127   : > { %v3899_v35 = vpop.f32.mrf.mxu0  ;;  %v5116_v25 = vpop.f32.mrf.mxu1  ;;  %4202 = vmatmul.mubr.msk.f32.gmra.mxu0 %vm452_vm1, %v4593_v33  ;;  %4240 = vmatmul.mubr.msk.f32.gmra.mxu1 %vm452_vm1, %v4643_v41 }
 0x128   : > { %v834_v32 = vadd.f32 %v818_v28, %v4460_v4  ;;  %v820_v54 = vmax.f32 %v788_v22, %v804_v31  ;;  %v803_v55 = vmul.f32 0.1, %v787_v34  ;;  %v789_v56 = vadd.f32 %v3899_v35, %v4978_v63  ;;  %4204 = vmatprep.mubr.msk.f32.mxu0 %vm452_vm1, %v4617_v36  ;;  %4242 = vmatprep.mubr.msk.f32.mxu1 %vm452_vm1, %v4653_v42 }
 0x129   : > { %v704_v26 = vpop.f32.mrf.mxu0  ;;  %v5128_v61 = vpop.f32.mrf.mxu1 }
 0x12a   : > { %851 = vst.msk [vmem:[%s4429_s17 + $0x18] sm:$0xff] %vm847_vm3, %v834_v32  ;;  %v836_v33 = vadd.f32 %v820_v54, %v4466_v6  ;;  %v819_v62 = vmax.f32 %v787_v34, %v803_v55  ;;  %v805_v29 = vmul.f32 0.1, %v789_v56 }
 0x12b   : > { %v3902_v18 = vpop.f32.mrf.mxu0  ;;  %v5133_v19 = vpop.f32.mrf.mxu1  ;;  %4205 = vmatmul.mubr.msk.f32.gmra.mxu0 %vm452_vm1, %v4619_v37  ;;  %4243 = vmatmul.mubr.msk.f32.gmra.mxu1 %vm452_vm1, %v4655_v43 }
 0x12c   : > { %853 = vst.msk [vmem:[%s4429_s17 + $0x28] sm:$0xff] %vm847_vm3, %v836_v33  ;;  %v835_v36 = vadd.f32 %v819_v62, %v4463_v5  ;;  %v821_v30 = vmax.f32 %v789_v56, %v805_v29  ;;  %4207 = vmatprep.mubr.msk.f32.mxu0 %vm452_vm1, %v4629_v38  ;;  %4245 = vmatprep.mubr.msk.f32.mxu1 %vm452_vm1, %v4665_v44 }
 0x12d   : > { %v713_v22 = vpop.f32.mrf.mxu0  ;;  %v5146_v23 = vpop.f32.mrf.mxu1 }
 0x12e   : > { %852 = vst.msk [vmem:[%s4429_s17 + $0x20] sm:$0xff] %vm847_vm3, %v835_v36  ;;  %v837_v37 = vadd.f32 %v821_v30, %v4475_v7  ;;  %v790_v28 = vadd.f32 %v4978_v63, %v713_v22 }
 0x12f   : > { %v3905_v31 = vpop.f32.mrf.mxu0  ;;  %v5152_v34 = vpop.f32.mrf.mxu1  ;;  %4208 = vmatmul.mubr.msk.f32.gmra.mxu0 %vm452_vm1, %v4631_v39  ;;  %4246 = vmatmul.mubr.msk.f32.gmra.mxu1 %vm452_vm1, %v4667_v45 }
 0x130   : > { %854 = vst.msk [vmem:[%s4429_s17 + $0x30] sm:$0xff] %vm847_vm3, %v837_v37  ;;  %v806_v38 = vmul.f32 0.1, %v790_v28  ;;  %v792_v35 = vadd.f32 %v3905_v31, %v4978_v63  ;;  %4210 = vmatprep.mubr.msk.f32.mxu0 %vm452_vm1, %v4641_v40  ;;  %4248 = vmatprep.mubr.msk.f32.mxu1 %vm452_vm1, %v4677_v46 }
 0x131   : > { %v722_v32 = vpop.f32.mrf.mxu0  ;;  %v5165_v54 = vpop.f32.mrf.mxu1 }
 0x132   : > { %v822_v55 = vmax.f32 %v790_v28, %v806_v38  ;;  %v808_v39 = vmul.f32 0.1, %v792_v35  ;;  %v791_v56 = vadd.f32 %v4978_v63, %v722_v32 }
 0x133   : > { %v3908_v26 = vpop.f32.mrf.mxu0  ;;  %v5168_v33 = vpop.f32.mrf.mxu1  ;;  %4211 = vmatmul.mubr.msk.f32.gmra.mxu0 %vm452_vm1, %v4643_v41  ;;  %4249 = vmatmul.mubr.msk.f32.gmra.mxu1 %vm452_vm1, %v4679_v47 }
 0x134   : > { %v838_v40 = vadd.f32 %v822_v55, %v4478_v8  ;;  %v824_v62 = vmax.f32 %v792_v35, %v808_v39  ;;  %v807_v29 = vmul.f32 0.1, %v791_v56  ;;  %v793_v18 = vadd.f32 %v3908_v26, %v4978_v63  ;;  %4213 = vmatprep.mubr.msk.f32.mxu0 %vm452_vm1, %v4653_v42  ;;  %4251 = vmatprep.mubr.msk.f32.mxu1 %vm452_vm1, %v4689_v48 }
 0x135   : > { %v732_v36 = vpop.f32.mrf.mxu0  ;;  %v5180_v30 = vpop.f32.mrf.mxu1 }
 0x136   : > { %855 = vst.msk [vmem:[%s4429_s17 + $0x38] sm:$0xff] %vm847_vm3, %v838_v40  ;;  %v840_v41 = vadd.f32 %v824_v62, %v4490_v10  ;;  %v823_v22 = vmax.f32 %v791_v56, %v807_v29  ;;  %v809_v37 = vmul.f32 0.1, %v793_v18 }
 0x137   : > { %v3911_v28 = vpop.f32.mrf.mxu0  ;;  %v5185_v31 = vpop.f32.mrf.mxu1  ;;  %4214 = vmatmul.mubr.msk.f32.gmra.mxu0 %vm452_vm1, %v4655_v43  ;;  %4252 = vmatmul.mubr.msk.f32.gmra.mxu1 %vm452_vm1, %v4691_v49 }
 0x138   : > { %857 = vst.msk [vmem:[%s4429_s17 + $0x48] sm:$0xff] %vm847_vm3, %v840_v41  ;;  %v839_v42 = vadd.f32 %v823_v22, %v4481_v9  ;;  %v825_v38 = vmax.f32 %v793_v18, %v809_v37  ;;  %4216 = vmatprep.mubr.msk.f32.mxu0 %vm452_vm1, %v4665_v44  ;;  %4254 = vmatprep.mubr.msk.f32.mxu1 %vm452_vm1, %v4701_v50 }
 0x139   : > { %v741_v35 = vpop.f32.mrf.mxu0  ;;  %v5198_v32 = vpop.f32.mrf.mxu1 }
 0x13a   : > { %856 = vst.msk [vmem:[%s4429_s17 + $0x40] sm:$0xff] %vm847_vm3, %v839_v42  ;;  %v841_v43 = vadd.f32 %v825_v38, %v4493_v11  ;;  %v794_v55 = vadd.f32 %v4978_v63, %v741_v35 }
 0x13b   : > { %v3914_v39 = vpop.f32.mrf.mxu0  ;;  %v5204_v56 = vpop.f32.mrf.mxu1  ;;  %4217 = vmatmul.mubr.msk.f32.gmra.mxu0 %vm452_vm1, %v4667_v45  ;;  %4255 = vmatmul.mubr.msk.f32.gmra.mxu1 %vm452_vm1, %v4703_v51 }
 0x13c   : > { %858 = vst.msk [vmem:[%s4429_s17 + $0x50] sm:$0xff] %vm847_vm3, %v841_v43  ;;  %v810_v44 = vmul.f32 0.1, %v794_v55  ;;  %v796_v50 = vadd.f32 %v3914_v39, %v4978_v63  ;;  %4219 = vmatprep.mubr.msk.f32.mxu0 %vm452_vm1, %v4677_v46  ;;  %4257 = vmatprep.mubr.msk.f32.mxu1 %vm452_vm1, %v4713_v52 }
 0x13d   : > { %v750_v26 = vpop.f32.mrf.mxu0  ;;  %v5217_v40 = vpop.f32.mrf.mxu1 }
 0x13e   : > { %v826_v62 = vmax.f32 %v794_v55, %v810_v44  ;;  %v812_v45 = vmul.f32 0.1, %v796_v50  ;;  %v795_v29 = vadd.f32 %v4978_v63, %v750_v26  ;;  %v1770_v55 = vlaneseq }
 0x13f   : > { %v3917_v51 = vpop.f32.mrf.mxu0  ;;  %v5220_v18 = vpop.f32.mrf.mxu1  ;;  %4220 = vmatmul.mubr.msk.f32.gmra.mxu0 %vm452_vm1, %v4679_v47  ;;  %4258 = vmatmul.mubr.msk.f32.gmra.mxu1 %vm452_vm1, %v4821_v58 }
 0x140   : > { %v842_v46 = vadd.f32 %v826_v62, %v4496_v12  ;;  %v828_v52 = vmax.f32 %v796_v50, %v812_v45  ;;  %v811_v36 = vmul.f32 0.1, %v795_v29  ;;  %v797_v41 = vadd.f32 %v3917_v51, %v4978_v63  ;;  %4222 = vmatprep.mubr.msk.f32.mxu0 %vm452_vm1, %v4689_v48  ;;  %4260 = vmatprep.mubr.msk.f32.mxu1 %vm452_vm1, %v4823_v59 }
 0x141   : > { %v760_v22 = vpop.f32.mrf.mxu0  ;;  %v5232_v37 = vpop.f32.mrf.mxu1 }
 0x142   : > { %859 = vst.msk [vmem:[%s4429_s17 + $0x58] sm:$0xff] %vm847_vm3, %v842_v46  ;;  %v844_v47 = vadd.f32 %v828_v52, %v4508_v14  ;;  %v827_v58 = vmax.f32 %v795_v29, %v811_v36  ;;  %v813_v28 = vmul.f32 0.1, %v797_v41  ;;  %v5255_v29 = vshrl.u32 %v1770_v55, 7 }
 0x143   : > { %v3920_v42 = vpop.f32.mrf.mxu0  ;;  %v5237_v38 = vpop.f32.mrf.mxu1  ;;  %4223 = vmatmul.mubr.msk.f32.gmra.mxu0 %vm452_vm1, %v4691_v49  ;;  %4261 = vmatmul.mubr.msk.f32.gmra.mxu1 %vm452_vm1, %v4833_v60 }
 0x144   : > { %861 = vst.msk [vmem:[%s4429_s17 + $0x68] sm:$0xff] %vm847_vm3, %v844_v47  ;;  %v843_v48 = vadd.f32 %v827_v58, %v4505_v13  ;;  %v829_v59 = vmax.f32 %v797_v41, %v813_v28  ;;  %vm1772_vm4 = vcmp.lt.s32.totalorder %v5255_v29, 1  ;;  %vm3001_vm5 = vcmp.lt.s32.totalorder %v5255_v29, 7 }
 0x145   : > { %v769_v35 = vpop.f32.mrf.mxu0  ;;  %v5246_v43 = vpop.f32.mrf.mxu1 }
 0x146   : > { %860 = vst.msk [vmem:[%s4429_s17 + $0x60] sm:$0xff] %vm847_vm3, %v843_v48  ;;  %v845_v39 = vadd.f32 %v829_v59, %v4511_v15  ;;  %v798_v44 = vadd.f32 %v4978_v63, %v769_v35 }
 0x147   : > { %v3963_v50 = vpop.f32.mrf.mxu0  ;;  %v4001_v49 = vpop.f32.mrf.mxu1 }
 0x148   : > { %862 = vst.msk [vmem:[%s4429_s17 + $0x70] sm:$0xff] %vm847_vm3, %v845_v39  ;;  %v814_v60 = vmul.f32 0.1, %v798_v44  ;;  %v1322_v26 = vadd.f32 %v3963_v50, %v5053_v17 }
 0x149   : > { %v1316_v62 = vpop.f32.mrf.mxu0  ;;  %v1603_v45 = vpop.f32.mrf.mxu1 }
 0x14a   : > { %v830_v51 = vmax.f32 %v798_v44, %v814_v60  ;;  %v1723_v46 = vadd.f32 %v4001_v49, %v1322_v26  ;;  %v1317_v52 = vadd.f32 %v1316_v62, %v5064_v20 }
 0x14b   : > { %v3966_v36 = vpop.f32.mrf.mxu0  ;;  %v4004_v41 = vpop.f32.mrf.mxu1 }
 0x14c   : > { %v846_v63 = vadd.f32 %v830_v51, %v4520_v16  ;;  %v5259_v22 = vadd.f32 %v1603_v45, %v1317_v52  ;;  %v1332_v47 = vadd.f32 %v3966_v36, %v5067_v24  ;;  %v1747_v17 = vrot.slane %v1723_v46, 7 }
 0x14d   : > { %v1326_v58 = vpop.f32.mrf.mxu0  ;;  %v1613_v28 = vpop.f32.mrf.mxu1 }
 0x14e   : > { %863 = vst.msk [vmem:[%s4429_s17 + $0x78] sm:$0xff] %vm847_vm3, %v846_v63  ;;  %v1746_v42 = vrot.slane %v5259_v22, 7  ;;  %v1725_v48 = vadd.f32 %v4004_v41, %v1332_v47  ;;  %v1327_v20 = vadd.f32 %v1326_v58, %v5078_v53 }
 0x14f   : > { %v3969_v59 = vpop.f32.mrf.mxu0  ;;  %v4007_v35 = vpop.f32.mrf.mxu1 }
 0x150   : > { %v1724_v55 = vadd.f32 %v1613_v28, %v1327_v20  ;;  %v1342_v39 = vadd.f32 %v3969_v59, %v5081_v57  ;;  %v5272_v24 = vsel %vm1772_vm4, %v1746_v42, %v1747_v17  ;;  %v1749_v49 = vrot.slane %v1725_v48, 7 }
 0x151   : > { %v1336_v44 = vpop.f32.mrf.mxu0  ;;  %v1623_v50 = vpop.f32.mrf.mxu1 }
 0x152   : > { %v1748_v60 = vrot.slane %v1724_v55, 7  ;;  %v1727_v26 = vadd.f32 %v4007_v35, %v1342_v39  ;;  %v1337_v62 = vadd.f32 %v1336_v44, %v5094_v0 }
 0x153   : > { %v3972_v45 = vpop.f32.mrf.mxu0  ;;  %v4010_v53 = vpop.f32.mrf.mxu1 }
 0x154   : > { %v1726_v51 = vadd.f32 %v1623_v50, %v1337_v62  ;;  %v1352_v46 = vadd.f32 %v3972_v45, %v5100_v21  ;;  %v5278_v57 = vsel %vm1772_vm4, %v1748_v60, %v1749_v49  ;;  %v1751_v44 = vrot.slane %v1727_v26, 7 }
 0x155   : > { %v1346_v52 = vpop.f32.mrf.mxu0  ;;  %v1633_v36 = vpop.f32.mrf.mxu1 }
 0x156   : > { %v1750_v41 = vrot.slane %v1726_v51, 7  ;;  %v1729_v63 = vadd.f32 %v4010_v53, %v1352_v46  ;;  %v1347_v47 = vadd.f32 %v1346_v52, %v5113_v27 }
 0x157   : > { %v3975_v58 = vpop.f32.mrf.mxu0  ;;  %v4013_v28 = vpop.f32.mrf.mxu1 }
 0x158   : > { %v1728_v17 = vadd.f32 %v1633_v36, %v1347_v47  ;;  %v1362_v0 = vadd.f32 %v3975_v58, %v5116_v25  ;;  %v5284_v48 = vsel %vm1772_vm4, %v1749_v49, %v1750_v41  ;;  %v1753_v59 = vrot.slane %v1729_v63, 7 }
 0x159   : > { %v1356_v21 = vpop.f32.mrf.mxu0  ;;  %v1643_v20 = vpop.f32.mrf.mxu1 }
 0x15a   : > { %v1752_v35 = vrot.slane %v1728_v17, 7  ;;  %v1731_v55 = vadd.f32 %v4013_v28, %v1362_v0  ;;  %v1357_v39 = vadd.f32 %v1356_v21, %v5128_v61 }
 0x15b   : > { %v3978_v50 = vpop.f32.mrf.mxu0  ;;  %v4016_v60 = vpop.f32.mrf.mxu1 }
 0x15c   : > { %v1730_v27 = vadd.f32 %v1643_v20, %v1357_v39  ;;  %v1372_v62 = vadd.f32 %v3978_v50, %v5133_v19  ;;  %v5290_v25 = vsel %vm1772_vm4, %v1752_v35, %v1753_v59  ;;  %v5294_v53 = vsel %vm1772_vm4, %v1751_v44, %v1752_v35 }
 0x15d   : > { %v1366_v45 = vpop.f32.mrf.mxu0  ;;  %v1653_v49 = vpop.f32.mrf.mxu1  ;;  %v1755_v51 = vrot.slane %v1731_v55, 7 }
 0x15e   : > { %v1754_v46 = vrot.slane %v1730_v27, 7  ;;  %v1733_v52 = vadd.f32 %v4016_v60, %v1372_v62  ;;  %v1367_v61 = vadd.f32 %v1366_v45, %v5146_v23 }
 0x15f   : > { %v3981_v26 = vpop.f32.mrf.mxu0  ;;  %v4019_v36 = vpop.f32.mrf.mxu1 }
 0x160   : > { %v1732_v41 = vadd.f32 %v1653_v49, %v1367_v61  ;;  %v1382_v19 = vadd.f32 %v3981_v26, %v5152_v34  ;;  %v5300_v63 = vsel %vm1772_vm4, %v1754_v46, %v1755_v51  ;;  %v1757_v27 = vrot.slane %v1733_v52, 7 }
 0x161   : > { %v1376_v47 = vpop.f32.mrf.mxu0  ;;  %v1663_v58 = vpop.f32.mrf.mxu1 }
 0x162   : > { %v1756_v28 = vrot.slane %v1732_v41, 7  ;;  %v1735_v17 = vadd.f32 %v4019_v36, %v1382_v19  ;;  %v1377_v0 = vadd.f32 %v1376_v47, %v5165_v54 }
 0x163   : > { %v3984_v21 = vpop.f32.mrf.mxu0  ;;  %v4022_v20 = vpop.f32.mrf.mxu1 }
 0x164   : > { %v1734_v59 = vadd.f32 %v1663_v58, %v1377_v0  ;;  %v1392_v23 = vadd.f32 %v3984_v21, %v5168_v33  ;;  %v5306_v35 = vsel %vm1772_vm4, %v1755_v51, %v1756_v28  ;;  %v1759_v39 = vrot.slane %v1735_v17, 7 }
 0x165   : > { %v1386_v34 = vpop.f32.mrf.mxu0  ;;  %v1673_v55 = vpop.f32.mrf.mxu1 }
 0x166   : > { %v1758_v44 = vrot.slane %v1734_v59, 7  ;;  %v1737_v50 = vadd.f32 %v4022_v20, %v1392_v23  ;;  %v1387_v60 = vadd.f32 %v1386_v34, %v5180_v30 }
 0x167   : > { %v3987_v62 = vpop.f32.mrf.mxu0  ;;  %v4025_v45 = vpop.f32.mrf.mxu1 }
 0x168   : > { %v1736_v54 = vadd.f32 %v1673_v55, %v1387_v60  ;;  %v1402_v49 = vadd.f32 %v3987_v62, %v5185_v31  ;;  %v5312_v33 = vsel %vm1772_vm4, %v1758_v44, %v1759_v39  ;;  %v5316_v61 = vsel %vm1772_vm4, %v1757_v27, %v1758_v44 }
 0x169   : > { %v1396_v46 = vpop.f32.mrf.mxu0  ;;  %v1683_v51 = vpop.f32.mrf.mxu1  ;;  %v1761_v26 = vrot.slane %v1737_v50, 7 }
 0x16a   : > { %v1760_v36 = vrot.slane %v1736_v54, 7  ;;  %v1739_v41 = vadd.f32 %v4025_v45, %v1402_v49  ;;  %v1397_v30 = vadd.f32 %v1396_v46, %v5198_v32 }
 0x16b   : > { %v3990_v52 = vpop.f32.mrf.mxu0  ;;  %v4028_v19 = vpop.f32.mrf.mxu1 }
 0x16c   : > { %v1738_v47 = vadd.f32 %v1683_v51, %v1397_v30  ;;  %v1412_v31 = vadd.f32 %v3990_v52, %v5204_v56  ;;  %v5322_v58 = vsel %vm1772_vm4, %v1760_v36, %v1761_v26  ;;  %v1763_v62 = vrot.slane %v1739_v41, 7 }
 0x16d   : > { %v1406_v28 = vpop.f32.mrf.mxu0  ;;  %v1693_v17 = vpop.f32.mrf.mxu1 }
 0x16e   : > { %v1762_v0 = vrot.slane %v1738_v47, 7  ;;  %v1741_v21 = vadd.f32 %v4028_v19, %v1412_v31  ;;  %v1407_v20 = vadd.f32 %v1406_v28, %v5217_v40 }
 0x16f   : > { %v3993_v59 = vpop.f32.mrf.mxu0  ;;  %v4031_v23 = vpop.f32.mrf.mxu1 }
 0x170   : > { %v1740_v34 = vadd.f32 %v1693_v17, %v1407_v20  ;;  %v1422_v32 = vadd.f32 %v3993_v59, %v5220_v18  ;;  %v5328_v55 = vsel %vm1772_vm4, %v1761_v26, %v1762_v0  ;;  %v1765_v44 = vrot.slane %v1741_v21, 7 }
 0x171   : > { %v1416_v56 = vpop.f32.mrf.mxu0  ;;  %v1703_v39 = vpop.f32.mrf.mxu1 }
 0x172   : > { %v1764_v50 = vrot.slane %v1740_v34, 7  ;;  %v1743_v60 = vadd.f32 %v4031_v23, %v1422_v32  ;;  %v1417_v27 = vadd.f32 %v1416_v56, %v5232_v37 }
 0x173   : > { %v3996_v45 = vpop.f32.mrf.mxu0  ;;  %v4034_v54 = vpop.f32.mrf.mxu1 }
 0x174   : > { %v1742_v40 = vadd.f32 %v1703_v39, %v1417_v27  ;;  %v1432_v49 = vadd.f32 %v3996_v45, %v5237_v38  ;;  %v5334_v18 = vsel %vm1772_vm4, %v1764_v50, %v1765_v44  ;;  %v5338_v26 = vsel %vm1772_vm4, %v1763_v62, %v1764_v50 }
 0x175   : > { %v1426_v46 = vpop.f32.mrf.mxu0  ;;  %v1713_v51 = vpop.f32.mrf.mxu1  ;;  %v1767_v36 = vrot.slane %v1743_v60, 7 }
 0x176   : > { %v1766_v30 = vrot.slane %v1742_v40, 7  ;;  %v1745_v52 = vadd.f32 %v4034_v54, %v1432_v49  ;;  %v1427_v37 = vadd.f32 %v1426_v46, %v5246_v43 }
 0x177   : > { %v4039_v41 = vpop.f32.mrf.mxu0  ;;  %v4077_v19 = vpop.f32.mrf.mxu1 }
 0x178   : > { %v1769_v47 = vrot.slane %v1745_v52, 7  ;;  %v1744_v31 = vadd.f32 %v1713_v51, %v1427_v37  ;;  %v5341_v38 = vadd.f32 %v4077_v19, %v4039_v41  ;;  %v5345_v28 = vsel %vm1772_vm4, %v1766_v30, %v1767_v36 }
 0x179   : > { %v1878_v17 = vpop.f32.mrf.mxu0  ;;  %v2058_v0 = vpop.f32.mrf.mxu1 }
 0x17a   : > { %v1768_v21 = vrot.slane %v1744_v31, 7  ;;  %v5347_v20 = vadd.f32 %v2058_v0, %v1878_v17  ;;  %v5353_v43 = vsel %vm1772_vm4, %v1769_v47, %v1746_v42 }
 0x17b   : > { %v4042_v59 = vpop.f32.mrf.mxu0  ;;  %v4080_v23 = vpop.f32.mrf.mxu1 }
 0x17c   : > { %v5355_v34 = vadd.f32 %v4080_v23, %v4042_v59  ;;  %v5359_v32 = vsel %vm1772_vm4, %v1767_v36, %v1768_v21 }
 0x17d   : > { %v1888_v56 = vpop.f32.mrf.mxu0  ;;  %v2068_v39 = vpop.f32.mrf.mxu1 }
 0x17f   : > { %v4045_v44 = vpop.f32.mrf.mxu0  ;;  %v4083_v50 = vpop.f32.mrf.mxu1 }
 0x181   : > { %v1897_v60 = vpop.f32.mrf.mxu0  ;;  %v2077_v27 = vpop.f32.mrf.mxu1 }
 0x182   : > { %v5361_v62 = vadd.f32 %v2077_v27, %v1897_v60 }
 0x183   : > { %v4048_v22 = vpop.f32.mrf.mxu0  ;;  %v4086_v45 = vpop.f32.mrf.mxu1 }
 0x184   : > { %v5363_v42 = vadd.f32 %v4086_v45, %v4048_v22 }
 0x185   : > { %v1906_v54 = vpop.f32.mrf.mxu0  ;;  %v2086_v40 = vpop.f32.mrf.mxu1 }
 0x186   : > { %v5365_v49 = vadd.f32 %v2086_v40, %v1906_v54 }
 0x187   : > { %v4051_v46 = vpop.f32.mrf.mxu0  ;;  %v4089_v51 = vpop.f32.mrf.mxu1 }
 0x188   : > { %v5367_v36 = vadd.f32 %v4089_v51, %v4051_v46 }
 0x189   : > { %v1916_v30 = vpop.f32.mrf.mxu0  ;;  %v2096_v52 = vpop.f32.mrf.mxu1 }
 0x18b   : > { %v4054_v37 = vpop.f32.mrf.mxu0  ;;  %v4092_v41 = vpop.f32.mrf.mxu1 }
 0x18d   : > { %v1925_v19 = vpop.f32.mrf.mxu0  ;;  %v2105_v47 = vpop.f32.mrf.mxu1 }
 0x18e   : > { %v5369_v31 = vadd.f32 %v2105_v47, %v1925_v19 }
 0x18f   : > { %v4057_v17 = vpop.f32.mrf.mxu0  ;;  %v4095_v0 = vpop.f32.mrf.mxu1 }
 0x190   : > { %v5371_v21 = vadd.f32 %v4095_v0, %v4057_v17 }
 0x191   : > { %v1934_v59 = vpop.f32.mrf.mxu0  ;;  %v2114_v23 = vpop.f32.mrf.mxu1 }
 0x192   : > { %v5373_v56 = vadd.f32 %v2114_v23, %v1934_v59 }
 0x193   : > { %v4060_v39 = vpop.f32.mrf.mxu0  ;;  %v4098_v44 = vpop.f32.mrf.mxu1 }
 0x194   : > { %v5375_v50 = vadd.f32 %v4098_v44, %v4060_v39 }
 0x195   : > { %v1944_v60 = vpop.f32.mrf.mxu0  ;;  %v2124_v27 = vpop.f32.mrf.mxu1 }
 0x197   : > { %v4063_v22 = vpop.f32.mrf.mxu0  ;;  %v4101_v45 = vpop.f32.mrf.mxu1 }
 0x199   : > { %v1953_v54 = vpop.f32.mrf.mxu0  ;;  %v2133_v40 = vpop.f32.mrf.mxu1 }
 0x19a   : > { %v5377_v46 = vadd.f32 %v2133_v40, %v1953_v54 }
 0x19b   : > { %v4066_v51 = vpop.f32.mrf.mxu0  ;;  %v4104_v30 = vpop.f32.mrf.mxu1 }
 0x19c   : > { %v5379_v52 = vadd.f32 %v4104_v30, %v4066_v51 }
 0x19d   : > { %v1962_v37 = vpop.f32.mrf.mxu0  ;;  %v2142_v41 = vpop.f32.mrf.mxu1 }
 0x19e   : > { %v5381_v19 = vadd.f32 %v2142_v41, %v1962_v37 }
 0x19f   : > { %v4069_v47 = vpop.f32.mrf.mxu0  ;;  %v4107_v17 = vpop.f32.mrf.mxu1 }
 0x1a0   : > { %v5383_v0 = vadd.f32 %v4107_v17, %v4069_v47 }
 0x1a1   : > { %v1972_v59 = vpop.f32.mrf.mxu0  ;;  %v2152_v23 = vpop.f32.mrf.mxu1 }
 0x1a3   : > { %v4072_v39 = vpop.f32.mrf.mxu0  ;;  %v4110_v44 = vpop.f32.mrf.mxu1 }
 0x1a5   : > { %v1981_v60 = vpop.f32.mrf.mxu0  ;;  %v2161_v27 = vpop.f32.mrf.mxu1 }
 0x1a6   : > { %v5385_v22 = vadd.f32 %v2161_v27, %v1981_v60 }
 0x1a7   : > { %v4115_v45 = vpop.f32.mrf.mxu0  ;;  %v5387_v54 = vpop.f32.mrf.mxu1 }
 0x1a8   : > { %v2352_v40 = vadd.f32 %v4115_v45, %v5341_v38 }
 0x1a9   : > { %v2240_v51 = vpop.f32.mrf.mxu0  ;;  %v5390_v30 = vpop.f32.mrf.mxu1 }
 0x1aa   : > { %v5393_v37 = vadd.f32 %v2352_v40, %v5272_v24  ;;  %v2351_v41 = vadd.f32 %v2240_v51, %v5347_v20 }
 0x1ab   : > { %v4118_v47 = vpop.f32.mrf.mxu0  ;;  %v5396_v17 = vpop.f32.mrf.mxu1 }
 0x1ac   : > { %v5399_v59 = vadd.f32 %v2351_v41, %v5353_v43  ;;  %v2353_v23 = vadd.f32 %v4118_v47, %v5355_v34 }
 0x1ad   : > { %v2250_v39 = vpop.f32.mrf.mxu0  ;;  %v5402_v44 = vpop.f32.mrf.mxu1 }
 0x1ae   : > { %v5405_v38 = vadd.f32 %v2353_v23, %v5278_v57 }
 0x1af   : > { %v4121_v60 = vpop.f32.mrf.mxu0  ;;  %v5407_v27 = vpop.f32.mrf.mxu1 }
 0x1b1   : > { %v2259_v24 = vpop.f32.mrf.mxu0  ;;  %v5409_v45 = vpop.f32.mrf.mxu1 }
 0x1b2   : > { %v2354_v20 = vadd.f32 %v2259_v24, %v5361_v62 }
 0x1b3   : > { %v4124_v40 = vpop.f32.mrf.mxu0  ;;  %v5412_v51 = vpop.f32.mrf.mxu1 }
 0x1b4   : > { %v5415_v43 = vadd.f32 %v2354_v20, %v5284_v48  ;;  %v2356_v34 = vadd.f32 %v4124_v40, %v5363_v42 }
 0x1b5   : > { %v2268_v41 = vpop.f32.mrf.mxu0  ;;  %v5418_v47 = vpop.f32.mrf.mxu1 }
 0x1b6   : > { %v5421_v57 = vadd.f32 %v2356_v34, %v5290_v25  ;;  %v2355_v23 = vadd.f32 %v2268_v41, %v5365_v49 }
 0x1b7   : > { %v4127_v39 = vpop.f32.mrf.mxu0  ;;  %v5424_v60 = vpop.f32.mrf.mxu1 }
 0x1b8   : > { %v5427_v62 = vadd.f32 %v2355_v23, %v5294_v53  ;;  %v2357_v24 = vadd.f32 %v4127_v39, %v5367_v36 }
 0x1b9   : > { %v2278_v48 = vpop.f32.mrf.mxu0  ;;  %v5430_v20 = vpop.f32.mrf.mxu1 }
 0x1ba   : > { %v5433_v42 = vadd.f32 %v2357_v24, %v5300_v63 }
 0x1bb   : > { %v4130_v40 = vpop.f32.mrf.mxu0  ;;  %v5435_v16 = vpop.f32.mrf.mxu1 }
 0x1bd   : > { %v2287_v25 = vpop.f32.mrf.mxu0  ;;  %v5437_v34 = vpop.f32.mrf.mxu1 }
 0x1be   : > { %v2358_v49 = vadd.f32 %v2287_v25, %v5369_v31 }
 0x1bf   : > { %v4133_v41 = vpop.f32.mrf.mxu0  ;;  %v5440_v15 = vpop.f32.mrf.mxu1 }
 0x1c0   : > { %v5443_v53 = vadd.f32 %v2358_v49, %v5306_v35  ;;  %v2360_v36 = vadd.f32 %v4133_v41, %v5371_v21 }
 0x1c1   : > { %v2296_v23 = vpop.f32.mrf.mxu0  ;;  %v5446_v39 = vpop.f32.mrf.mxu1 }
 0x1c2   : > { %v5449_v63 = vadd.f32 %v2360_v36, %v5312_v33  ;;  %v2359_v24 = vadd.f32 %v2296_v23, %v5373_v56 }
 0x1c3   : > { %v4136_v48 = vpop.f32.mrf.mxu0  ;;  %v5452_v40 = vpop.f32.mrf.mxu1 }
 0x1c4   : > { %v5455_v31 = vadd.f32 %v2359_v24, %v5316_v61  ;;  %v2361_v25 = vadd.f32 %v4136_v48, %v5375_v50 }
 0x1c5   : > { %v2306_v35 = vpop.f32.mrf.mxu0  ;;  %v5458_v49 = vpop.f32.mrf.mxu1 }
 0x1c6   : > { %v5461_v21 = vadd.f32 %v2361_v25, %v5322_v58 }
 0x1c7   : > { %v4139_v41 = vpop.f32.mrf.mxu0  ;;  %v5463_v14 = vpop.f32.mrf.mxu1 }
 0x1c9   : > { %v2315_v33 = vpop.f32.mrf.mxu0  ;;  %v5465_v36 = vpop.f32.mrf.mxu1 }
 0x1ca   : > { %v2362_v56 = vadd.f32 %v2315_v33, %v5377_v46 }
 0x1cb   : > { %v4142_v23 = vpop.f32.mrf.mxu0  ;;  %v5468_v13 = vpop.f32.mrf.mxu1 }
 0x1cc   : > { %v5471_v61 = vadd.f32 %v2362_v56, %v5328_v55  ;;  %v2364_v50 = vadd.f32 %v4142_v23, %v5379_v52 }
 0x1cd   : > { %v2324_v24 = vpop.f32.mrf.mxu0  ;;  %v5474_v48 = vpop.f32.mrf.mxu1 }
 0x1ce   : > { %v5477_v58 = vadd.f32 %v2364_v50, %v5334_v18  ;;  %v2363_v25 = vadd.f32 %v2324_v24, %v5381_v19 }
 0x1cf   : > { %v4145_v35 = vpop.f32.mrf.mxu0  ;;  %v5480_v41 = vpop.f32.mrf.mxu1 }
 0x1d0   : > { %v5483_v46 = vadd.f32 %v2363_v25, %v5338_v26  ;;  %v2365_v33 = vadd.f32 %v4145_v35, %v5383_v0 }
 0x1d1   : > { %v2334_v55 = vpop.f32.mrf.mxu0  ;;  %v5486_v56 = vpop.f32.mrf.mxu1 }
 0x1d2   : > { %v5489_v52 = vadd.f32 %v2365_v33, %v5345_v28 }
 0x1d3   : > { %v4148_v23 = vpop.f32.mrf.mxu0  ;;  %v5491_v12 = vpop.f32.mrf.mxu1 }
 0x1d5   : > { %v2343_v18 = vpop.f32.mrf.mxu0  ;;  %v5493_v50 = vpop.f32.mrf.mxu1 }
 0x1d6   : > { %v2366_v19 = vadd.f32 %v2343_v18, %v5385_v22 }
 0x1d7   : > { %v4191_v24 = vpop.f32.mrf.mxu0  ;;  %v4229_v11 = vpop.f32.mrf.mxu1 }
 0x1d8   : > { %v5497_v26 = vadd.f32 %v2366_v19, %v5359_v32  ;;  %v2650_v0 = vadd.f32 %v4191_v24, %v5387_v54 }
 0x1d9   : > { %v2644_v25 = vpop.f32.mrf.mxu0  ;;  %v2834_v35 = vpop.f32.mrf.mxu1 }
 0x1da   : > { %v2954_v55 = vadd.f32 %v4229_v11, %v2650_v0  ;;  %v2645_v28 = vadd.f32 %v2644_v25, %v5390_v30  ;;  %v5507_v0 = vpop.permute.xlu0 %3034 }
 0x1db   : > { %v4194_v33 = vpop.f32.mrf.mxu0  ;;  %v4232_v23 = vpop.f32.mrf.mxu1 }
 0x1dc   : > { %v2953_v10 = vadd.f32 %v2834_v35, %v2645_v28  ;;  %v2660_v9 = vadd.f32 %v4194_v33, %v5396_v17  ;;  %v2978_v8 = vrot.slane %v2954_v55, 1 }
 0x1dd   : > { %v2654_v22 = vpop.f32.mrf.mxu0  ;;  %v2844_v18 = vpop.f32.mrf.mxu1 }
 0x1de   : > { %v2977_v7 = vrot.slane %v2953_v10, 1  ;;  %v2655_v32 = vadd.f32 %v2654_v22, %v5402_v44  ;;  %v2956_v35 = vadd.f32 %v4232_v23, %v2660_v9 }
 0x1df   : > { %v4197_v19 = vpop.f32.mrf.mxu0  ;;  %v4235_v54 = vpop.f32.mrf.mxu1 }
 0x1e0   : > { %v3017_v11 = vsel %vm3001_vm5, %v2977_v7, %v2978_v8  ;;  %v2955_v24 = vadd.f32 %v2844_v18, %v2655_v32  ;;  %v2670_v30 = vadd.f32 %v4197_v19, %v5407_v27  ;;  %v2980_v32 = vrot.slane %v2956_v35, 1 }
 0x1e1   : > { %v3018_v25 = vadd.f32 %v3017_v11, %v5399_v59  ;;  %v2664_v17 = vpop.f32.mrf.mxu0  ;;  %v2854_v28 = vpop.f32.mrf.mxu1 }
 0x1e2   : > { %v2979_v33 = vrot.slane %v2955_v24, 1  ;;  %v2958_v55 = vadd.f32 %v4235_v54, %v2670_v30  ;;  %v2665_v10 = vadd.f32 %v2664_v17, %v5409_v45 }
 0x1e3   : > { %v4200_v44 = vpop.f32.mrf.mxu0  ;;  %v4238_v22 = vpop.f32.mrf.mxu1  ;;  %v3037_v6 = vadd.f32 %v5507_v0, %v3018_v25 }
 0x1e4   : > { %v3016_v7 = vsel %vm3001_vm5, %v2978_v8, %v2979_v33  ;;  %v2957_v18 = vadd.f32 %v2854_v28, %v2665_v10  ;;  %v2680_v27 = vadd.f32 %v4200_v44, %v5412_v51  ;;  %v2982_v11 = vrot.slane %v2958_v55, 1 }
 0x1e5   : > { %v2674_v19 = vpop.f32.mrf.mxu0  ;;  %v2864_v59 = vpop.f32.mrf.mxu1  ;;  %v3053_v9 = vmul.f32 0.1, %v3037_v6  ;;  %v3019_v23 = vadd.f32 %v3016_v7, %v5393_v37 }
 0x1e6   : > { %v2981_v54 = vrot.slane %v2957_v18, 1  ;;  %v2960_v24 = vadd.f32 %v4238_v22, %v2680_v27  ;;  %v2675_v45 = vadd.f32 %v2674_v19, %v5418_v47 }
 0x1e7   : > { %v4203_v30 = vpop.f32.mrf.mxu0  ;;  %v4241_v17 = vpop.f32.mrf.mxu1  ;;  %v3069_v25 = vmax.f32 %v3037_v6, %v3053_v9  ;;  %v3038_v5 = vadd.f32 %v5507_v0, %v3019_v23 }
 0x1e8   : > { %v3014_v8 = vsel %vm3001_vm5, %v2981_v54, %v2982_v11  ;;  %v3015_v51 = vsel %vm3001_vm5, %v2980_v32, %v2981_v54  ;;  %v2959_v35 = vadd.f32 %v2864_v59, %v2675_v45  ;;  %v2690_v33 = vadd.f32 %v4203_v30, %v5424_v60 }
 0x1e9   : > { %v3020_v28 = vadd.f32 %v3015_v51, %v5405_v38  ;;  %v3021_v37 = vadd.f32 %v3014_v8, %v5415_v43  ;;  %v2684_v55 = vpop.f32.mrf.mxu0  ;;  %3101 = vrot.lane.b32.xlu0 %v3069_v25, %s4352_s21  ;;  %v2874_v6 = vpop.f32.mrf.mxu1  ;;  %v3054_v47 = vmul.f32 0.1, %v3038_v5  ;;  %v2984_v10 = vrot.slane %v2960_v24, 1 }
 0x1ea   : > { %v2983_v44 = vrot.slane %v2959_v35, 1  ;;  %v2685_v22 = vadd.f32 %v2684_v55, %v5430_v20  ;;  %v2962_v9 = vadd.f32 %v4241_v17, %v2690_v33 }
 0x1eb   : > { %v4206_v7 = vpop.f32.mrf.mxu0  ;;  %v4244_v18 = vpop.f32.mrf.mxu1  ;;  %v3070_v27 = vmax.f32 %v3038_v5, %v3054_v47  ;;  %v3039_v32 = vadd.f32 %v5507_v0, %v3020_v28  ;;  %v3040_v38 = vadd.f32 %v5507_v0, %v3021_v37 }
 0x1ec   : > { %v3013_v43 = vsel %vm3001_vm5, %v2983_v44, %v2984_v10  ;;  %v2961_v60 = vadd.f32 %v2874_v6, %v2685_v22  ;;  %v2700_v19 = vadd.f32 %v4206_v7, %v5435_v16  ;;  %v2986_v28 = vrot.slane %v2962_v9, 1 }
 0x1ed   : > { %v3022_v59 = vadd.f32 %v3013_v43, %v5427_v62  ;;  %v2694_v23 = vpop.f32.mrf.mxu0  ;;  %3103 = vrot.lane.b32.xlu1 %v3070_v27, %s4352_s21  ;;  %v2884_v20 = vpop.f32.mrf.mxu1  ;;  %v3055_v11 = vmul.f32 0.1, %v3039_v32  ;;  %v3056_v54 = vmul.f32 0.1, %v3040_v38 }
 0x1ee   : > { %v2985_v5 = vrot.slane %v2961_v60, 1  ;;  %v2964_v24 = vadd.f32 %v4244_v18, %v2700_v19  ;;  %v2695_v45 = vadd.f32 %v2694_v23, %v5437_v34 }
 0x1ef   : > { %v4209_v30 = vpop.f32.mrf.mxu0  ;;  %v4247_v25 = vpop.f32.mrf.mxu1  ;;  %v3071_v8 = vmax.f32 %v3039_v32, %v3055_v11  ;;  %v3072_v51 = vmax.f32 %v3040_v38, %v3056_v54  ;;  %v3041_v35 = vadd.f32 %v5507_v0, %v3022_v59 }
 0x1f0   : > { %v3012_v16 = vsel %vm3001_vm5, %v2984_v10, %v2985_v5  ;;  %v2963_v62 = vadd.f32 %v2884_v20, %v2695_v45  ;;  %v2710_v17 = vadd.f32 %v4209_v30, %v5440_v15  ;;  %v2988_v6 = vrot.slane %v2964_v24, 1 }
 0x1f1   : > { %v3023_v37 = vadd.f32 %v3012_v16, %v5421_v57  ;;  %v2704_v33 = vpop.f32.mrf.mxu0  ;;  %3105 = vrot.lane.b32.xlu1 %v3071_v8, %s4352_s21  ;;  %3107 = vrot.lane.b32.xlu0 %v3072_v51, %s4352_s21  ;;  %v2894_v34 = vpop.f32.mrf.mxu1  ;;  %v3057_v55 = vmul.f32 0.1, %v3041_v35 }
 0x1f2   : > { %v2987_v47 = vrot.slane %v2963_v62, 1  ;;  %v2966_v44 = vadd.f32 %v4247_v25, %v2710_v17  ;;  %v2705_v22 = vadd.f32 %v2704_v33, %v5446_v39 }
 0x1f3   : > { %v4212_v7 = vpop.f32.mrf.mxu0  ;;  %v4250_v10 = vpop.f32.mrf.mxu1  ;;  %v3073_v18 = vmax.f32 %v3041_v35, %v3057_v55  ;;  %v3042_v15 = vadd.f32 %v5507_v0, %v3023_v37 }
 0x1f4   : > { %v3010_v57 = vsel %vm3001_vm5, %v2987_v47, %v2988_v6  ;;  %v3011_v27 = vsel %vm3001_vm5, %v2986_v28, %v2987_v47  ;;  %v2965_v32 = vadd.f32 %v2894_v34, %v2705_v22  ;;  %v2720_v60 = vadd.f32 %v4212_v7, %v5452_v40 }
 0x1f5   : > { %v3024_v38 = vadd.f32 %v3011_v27, %v5433_v42  ;;  %v3025_v43 = vadd.f32 %v3010_v57, %v5443_v53  ;;  %v2714_v19 = vpop.f32.mrf.mxu0  ;;  %3109 = vrot.lane.b32.xlu1 %v3073_v18, %s4352_s21  ;;  %v2904_v39 = vpop.f32.mrf.mxu1  ;;  %v3058_v59 = vmul.f32 0.1, %v3042_v15  ;;  %v2990_v9 = vrot.slane %v2966_v44, 1 }
 0x1f6   : > { %v2989_v23 = vrot.slane %v2965_v32, 1  ;;  %v2715_v20 = vadd.f32 %v2714_v19, %v5458_v49  ;;  %v2968_v25 = vadd.f32 %v4250_v10, %v2720_v60 }
 0x1f7   : > { %v4215_v11 = vpop.f32.mrf.mxu0  ;;  %v4253_v54 = vpop.f32.mrf.mxu1  ;;  %v3074_v5 = vmax.f32 %v3042_v15, %v3058_v59  ;;  %v3043_v24 = vadd.f32 %v5507_v0, %v3024_v38  ;;  %v3044_v42 = vadd.f32 %v5507_v0, %v3025_v43 }
 0x1f8   : > { %v3009_v53 = vsel %vm3001_vm5, %v2989_v23, %v2990_v9  ;;  %v2967_v40 = vadd.f32 %v2904_v39, %v2715_v20  ;;  %v2730_v45 = vadd.f32 %v4215_v11, %v5463_v14  ;;  %v2992_v47 = vrot.slane %v2968_v25, 1 }
 0x1f9   : > { %v3026_v30 = vadd.f32 %v3009_v53, %v5455_v31  ;;  %v2724_v8 = vpop.f32.mrf.mxu0  ;;  %3111 = vrot.lane.b32.xlu0 %v3074_v5, %s4352_s21  ;;  %v2914_v49 = vpop.f32.mrf.mxu1  ;;  %v3059_v51 = vmul.f32 0.1, %v3043_v24  ;;  %v3060_v35 = vmul.f32 0.1, %v3044_v42 }
 0x1fa   : > { %v2991_v16 = vrot.slane %v2967_v40, 1  ;;  %v2970_v62 = vadd.f32 %v4253_v54, %v2730_v45  ;;  %v2725_v17 = vadd.f32 %v2724_v8, %v5465_v36 }
 0x1fb   : > { %v4218_v28 = vpop.f32.mrf.mxu0  ;;  %v4256_v37 = vpop.f32.mrf.mxu1  ;;  %v3075_v33 = vmax.f32 %v3043_v24, %v3059_v51  ;;  %v3076_v34 = vmax.f32 %v3044_v42, %v3060_v35  ;;  %v3045_v55 = vadd.f32 %v5507_v0, %v3026_v30 }
 0x1fc   : > { %v3008_v14 = vsel %vm3001_vm5, %v2990_v9, %v2991_v16  ;;  %v2969_v31 = vadd.f32 %v2914_v49, %v2725_v17  ;;  %v2740_v6 = vadd.f32 %v4218_v28, %v5468_v13  ;;  %v2994_v10 = vrot.slane %v2970_v62, 1 }
 0x1fd   : > { %v3027_v44 = vadd.f32 %v3008_v14, %v5449_v63  ;;  %v2734_v22 = vpop.f32.mrf.mxu0  ;;  %3113 = vrot.lane.b32.xlu1 %v3075_v33, %s4352_s21  ;;  %3115 = vrot.lane.b32.xlu0 %v3076_v34, %s4352_s21  ;;  %v2924_v36 = vpop.f32.mrf.mxu1  ;;  %v3061_v7 = vmul.f32 0.1, %v3045_v55 }
 0x1fe   : > { %v2993_v18 = vrot.slane %v2969_v31, 1  ;;  %v2972_v15 = vadd.f32 %v4256_v37, %v2740_v6  ;;  %v2735_v57 = vadd.f32 %v2734_v22, %v5474_v48 }
 0x1ff   : > { %v4221_v27 = vpop.f32.mrf.mxu0  ;;  %v4259_v32 = vpop.f32.mrf.mxu1  ;;  %v3077_v38 = vmax.f32 %v3045_v55, %v3061_v7  ;;  %v3046_v13 = vadd.f32 %v5507_v0, %v3027_v44 }
 0x200   : > { %v3006_v63 = vsel %vm3001_vm5, %v2993_v18, %v2994_v10  ;;  %v3007_v43 = vsel %vm3001_vm5, %v2992_v47, %v2993_v18  ;;  %v2971_v60 = vadd.f32 %v2924_v36, %v2735_v57  ;;  %v2996_v23 = vrot.slane %v2972_v15, 1 }
 0x201   : > { %v3028_v19 = vadd.f32 %v3007_v43, %v5461_v21  ;;  %v3029_v39 = vadd.f32 %v3006_v63, %v5471_v61  ;;  %v2744_v59 = vpop.f32.mrf.mxu0  ;;  %3117 = vrot.lane.b32.xlu1 %v3077_v38, %s4352_s21  ;;  %v2934_v48 = vpop.f32.mrf.mxu1  ;;  %v3062_v9 = vmul.f32 0.1, %v3046_v13  ;;  %v2750_v11 = vadd.f32 %v4221_v27, %v5480_v41  ;;  %v5702_v43 = vld [vmem:[#allocation3_spill] sm:$0xff] }
 0x202   : > { %v2995_v20 = vrot.slane %v2971_v60, 1  ;;  %v2745_v54 = vadd.f32 %v2744_v59, %v5486_v56 }
 0x203   : > { %v4224_v5 = vpop.f32.mrf.mxu0  ;;  %v4262_v24 = vpop.f32.mrf.mxu1  ;;  %v3078_v42 = vmax.f32 %v3046_v13, %v3062_v9  ;;  %v3047_v53 = vadd.f32 %v5507_v0, %v3028_v19  ;;  %v3048_v21 = vadd.f32 %v5507_v0, %v3029_v39  ;;  %v2974_v8 = vadd.f32 %v4259_v32, %v2750_v11  ;;  %v5703_v19 = vld [vmem:[#allocation4_spill] sm:$0xff]  ;;  %v5705_v9 = vld [vmem:[#allocation6_spill] sm:$0xff]  ;;  %v5706_v11 = vld [vmem:[#allocation7_spill] sm:$0xff] }
 0x204   : > { %v3005_v61 = vsel %vm3001_vm5, %v2995_v20, %v2996_v23  ;;  %v2973_v40 = vadd.f32 %v2934_v48, %v2745_v54  ;;  %v2760_v45 = vadd.f32 %v4224_v5, %v5491_v12 }
 0x205   : > { %v3030_v30 = vadd.f32 %v3005_v61, %v5483_v46  ;;  %v2754_v25 = vpop.f32.mrf.mxu0  ;;  %3119 = vrot.lane.b32.xlu0 %v3078_v42, %s4352_s21  ;;  %v3063_v41 = vmul.f32 0.1, %v3047_v53  ;;  %v3064_v56 = vmul.f32 0.1, %v3048_v21  ;;  %v2944_v16 = vpop.f32.mrf.mxu1  ;;  %v2998_v34 = vrot.slane %v2974_v8, 1  ;;  %v5708_v61 = vld [vmem:[#allocation9_spill] sm:$0xff] }
 0x206   : > { %v2997_v49 = vrot.slane %v2973_v40, 1  ;;  %v2976_v51 = vadd.f32 %v4262_v24, %v2760_v45  ;;  %v2755_v35 = vadd.f32 %v2754_v25, %v5493_v50  ;;  %v5707_v24 = vld [vmem:[#allocation8_spill] sm:$0xff]  ;;  %v5709_v45 = vld [vmem:[#allocation10_spill] sm:$0xff] }
 0x207   : > { %v3079_v62 = vmax.f32 %v3047_v53, %v3063_v41  ;;  %v3080_v17 = vmax.f32 %v3048_v21, %v3064_v56  ;;  %v3049_v28 = vadd.f32 %v5507_v0, %v3030_v30  ;;  %v5710_v41 = vld [vmem:[#allocation11_spill] sm:$0xff] }
 0x208   : > { %v3004_v12 = vsel %vm3001_vm5, %v2996_v23, %v2997_v49  ;;  %v2975_v37 = vadd.f32 %v2944_v16, %v2755_v35  ;;  %v3000_v55 = vrot.slane %v2976_v51, 1  ;;  %v5711_v49 = vld [vmem:[#allocation12_spill] sm:$0xff] }
 0x209   : > { %v3031_v46 = vadd.f32 %v3004_v12, %v5477_v58  ;;  %3121 = vrot.lane.b32.xlu1 %v3079_v62, %s4352_s21  ;;  %3123 = vrot.lane.b32.xlu0 %v3080_v17, %s4352_s21  ;;  %v3065_v33 = vmul.f32 0.1, %v3049_v28  ;;  %v5712_v62 = vld [vmem:[#allocation13_spill] sm:$0xff] }
 0x20a   : > { %v2999_v14 = vrot.slane %v2975_v37, 1 }
 0x20b   : > { %v3081_v50 = vmax.f32 %v3049_v28, %v3065_v33  ;;  %v3050_v31 = vadd.f32 %v5507_v0, %v3031_v46  ;;  %v5713_v28 = vld [vmem:[#allocation14_spill] sm:$0xff] }
 0x20c   : > { %v3002_v6 = vsel %vm3001_vm5, %v2999_v14, %v3000_v55  ;;  %v3003_v47 = vsel %vm3001_vm5, %v2998_v34, %v2999_v14 }
 0x20d   : > { %v3032_v44 = vadd.f32 %v3003_v47, %v5489_v52  ;;  %v3033_v58 = vadd.f32 %v3002_v6, %v5497_v26  ;;  %3125 = vrot.lane.b32.xlu1 %v3081_v50, %s4352_s21  ;;  %v3066_v22 = vmul.f32 0.1, %v3050_v31 }
 0x20f   : > { %v3082_v36 = vmax.f32 %v3050_v31, %v3066_v22  ;;  %v3051_v7 = vadd.f32 %v5507_v0, %v3032_v44  ;;  %v3052_v10 = vadd.f32 %v5507_v0, %v3033_v58 }
 0x211   : > { %3127 = vrot.lane.b32.xlu0 %v3082_v36, %s4352_s21  ;;  %v3067_v18 = vmul.f32 0.1, %v3051_v7  ;;  %v3068_v15 = vmul.f32 0.1, %v3052_v10 }
 0x213   : > { %v3083_v29 = vmax.f32 %v3051_v7, %v3067_v18  ;;  %v3084_v52 = vmax.f32 %v3052_v10, %v3068_v15 }
 0x215   : > { %3129 = vrot.lane.b32.xlu1 %v3083_v29, %s4352_s21  ;;  %3131 = vrot.lane.b32.xlu0 %v3084_v52, %s4352_s21 }
 0x25b   : > { %v3102_v26 = vpop.permute.xlu0 %3101 }
 0x25c   : > { %v3149_v57 = vadd.f32 %v3102_v26, %v4445_v1 }
 0x25e   : > { %3166 = vst.msk [vmem:[%s4429_s17] sm:$0xff] %vm3165_vm6, %v3149_v57 }
 0x25f   : > { %v3104_v0 = vpop.permute.xlu1 %3103 }
 0x260   : > { %v3150_v27 = vadd.f32 %v3104_v0, %v4448_v2 }
 0x262   : > { %3167 = vst.msk [vmem:[%s4429_s17 + $0x8] sm:$0xff] %vm3165_vm6, %v3150_v27 }
 0x263   : > { %v3106_v32 = vpop.permute.xlu1 %3105  ;;  %v3108_v38 = vpop.permute.xlu0 %3107 }
 0x264   : > { %v3151_v13 = vadd.f32 %v3106_v32, %v4451_v3  ;;  %v3152_v63 = vadd.f32 %v3108_v38, %v4460_v4  ;;  %v5704_v4 = vld [vmem:[#allocation5_spill] sm:$0xff] }
 0x266   : > { %3168 = vst.msk [vmem:[%s4429_s17 + $0x10] sm:$0xff] %vm3165_vm6, %v3151_v13  ;;  %3169 = vst.msk [vmem:[%s4429_s17 + $0x18] sm:$0xff] %vm3165_vm6, %v3152_v63 }
 0x267   : > { %v3110_v1 = vpop.permute.xlu1 %3109 }
 0x268   : > { %v3153_v60 = vadd.f32 %v3110_v1, %v5702_v43 }
 0x26a   : > { %3170 = vst.msk [vmem:[%s4429_s17 + $0x20] sm:$0xff] %vm3165_vm6, %v3153_v60 }
 0x26b   : > { %v3112_v2 = vpop.permute.xlu0 %3111 }
 0x26c   : > { %v3154_v39 = vadd.f32 %v3112_v2, %v5703_v19 }
 0x26e   : > { %3171 = vst.msk [vmem:[%s4429_s17 + $0x28] sm:$0xff] %vm3165_vm6, %v3154_v39 }
 0x26f   : > { %v3114_v59 = vpop.permute.xlu1 %3113  ;;  %v3116_v3 = vpop.permute.xlu0 %3115 }
 0x270   : > { %v3155_v48 = vadd.f32 %v3114_v59, %v5704_v4  ;;  %v3156_v23 = vadd.f32 %v3116_v3, %v5705_v9 }
 0x272   : > { %3172 = vst.msk [vmem:[%s4429_s17 + $0x30] sm:$0xff] %vm3165_vm6, %v3155_v48  ;;  %3173 = vst.msk [vmem:[%s4429_s17 + $0x38] sm:$0xff] %vm3165_vm6, %v3156_v23 }
 0x273   : > { %v3118_v20 = vpop.permute.xlu1 %3117 }
 0x274   : > { %v3157_v54 = vadd.f32 %v3118_v20, %v5706_v11 }
 0x276   : > { %3174 = vst.msk [vmem:[%s4429_s17 + $0x40] sm:$0xff] %vm3165_vm6, %v3157_v54 }
 0x277   : > { %v3120_v5 = vpop.permute.xlu0 %3119 }
 0x278   : > { %v3158_v42 = vadd.f32 %v3120_v5, %v5707_v24 }
 0x27a   : > { %3175 = vst.msk [vmem:[%s4429_s17 + $0x48] sm:$0xff] %vm3165_vm6, %v3158_v42 }
 0x27b   : > { %v3122_v53 = vpop.permute.xlu1 %3121  ;;  %v3124_v21 = vpop.permute.xlu0 %3123 }
 0x27c   : > { %v3159_v40 = vadd.f32 %v3122_v53, %v5708_v61  ;;  %v3160_v30 = vadd.f32 %v3124_v21, %v5709_v45 }
 0x27e   : > { %3176 = vst.msk [vmem:[%s4429_s17 + $0x50] sm:$0xff] %vm3165_vm6, %v3159_v40  ;;  %3177 = vst.msk [vmem:[%s4429_s17 + $0x58] sm:$0xff] %vm3165_vm6, %v3160_v30 }
 0x27f   : > { %v3126_v25 = vpop.permute.xlu1 %3125 }
 0x280   : > { %v3161_v56 = vadd.f32 %v3126_v25, %v5710_v41 }
 0x282   : > { %3178 = vst.msk [vmem:[%s4429_s17 + $0x60] sm:$0xff] %vm3165_vm6, %v3161_v56 }
 0x283   : > { %v3128_v8 = vpop.permute.xlu0 %3127 }
 0x284   : > { %v3162_v51 = vadd.f32 %v3128_v8, %v5711_v49 }
 0x286   : > { %3179 = vst.msk [vmem:[%s4429_s17 + $0x68] sm:$0xff] %vm3165_vm6, %v3162_v51 }
 0x287   : > { %v3130_v35 = vpop.permute.xlu1 %3129  ;;  %v3132_v16 = vpop.permute.xlu0 %3131 }
 0x288   : > { %v3163_v17 = vadd.f32 %v3130_v35, %v5712_v62  ;;  %v3164_v12 = vadd.f32 %v3132_v16, %v5713_v28 }
 0x28a   : > { %3180 = vst.msk [vmem:[%s4429_s17 + $0x70] sm:$0xff] %vm3165_vm6, %v3163_v17  ;;  %3181 = vst.msk [vmem:[%s4429_s17 + $0x78] sm:$0xff] %vm3165_vm6, %v3164_v12 }
 0x28b PF: > { %s16_s25 = sadd.s32 1, %s4346_s25   ;;  %s5714_s21 = smov %s4338_s23 }
 0x28c   : > { %p13_p0 = scmp.ge.s32.totalorder %s16_s25, 6   ;;  %s5715_s22 = smov %s4342_s24 }
 0x28d   : > { %s5716_s23 = smov %s5719_s26  ;;  %s5717_s24 = smov %s5723_s27 }
 0x28e   :  { %15 = sbr.rel (!%p13_p0) target bundleno = 3 (0x3), region = 112 }

</bundles_post_ra>
